<compile_context>
chip_gen: v6e
topology: v6e:2x2x1
jax: 0.10.0
libtpu: 0.0.40
codegen_flags: <defaults>
</compile_context>

<pallas_src>
import jax
import jax.numpy as jnp
from jax import lax
from jax.experimental import pallas as pl
from jax.experimental.pallas import tpu as pltpu

C_SE = 34     # squeeze channels
C_MID = 816   # expanded channels
C_OUT = 136   # output channels
H = W = 14
HW = H * W


def _se_mul_conv_kernel(se_ref, w1_ref, b1_ref, x_ref, w2_ref, o_ref):
    # se_ref : [1, C_SE]       squeeze vector (x220)
    # w1_ref : [C_MID, C_SE]   conv2d72 weight, native PyTorch layout
    # b1_ref : [1, C_MID]      conv2d72 bias
    # x_ref  : [C_MID, HW]     x217 flattened, channels on sublanes (native NCHW)
    # w2_ref : [C_OUT, C_MID]  conv2d73 weight, native layout
    # o_ref  : [C_OUT, HW]     maps straight back to NCHW via reshape
    #
    # gate[1, C_MID] = se @ w1^T  (contract the C_SE axis of both operands)
    gate = lax.dot_general(
        se_ref[...], w1_ref[...],
        dimension_numbers=(((1,), (1,)), ((), ())),
        preferred_element_type=jnp.float32,
    ) + b1_ref[...]
    gate = jax.nn.sigmoid(gate)                       # [1, C_MID]

    # Fold the gate into the smaller operand (w2: 136x816 < x: 816x196),
    # then one MXU matmul: o = (w2 * gate) @ x.
    w2s = w2_ref[...] * gate                          # sublane broadcast
    o_ref[...] = jnp.dot(w2s, x_ref[...],
                         preferred_element_type=jnp.float32)


def se_mul_conv(x220, x217, w1, b1, w2):
    """x220: [1,C_SE,1,1], x217: [1,C_MID,H,W], w1: [C_MID,C_SE,1,1],
       b1: [C_MID], w2: [C_OUT,C_MID,1,1]  ->  [1,C_OUT,H,W] (NCHW)."""
    # Pure reshapes only -- no transposes, no extra HBM passes.
    se_row = x220.reshape(1, C_SE)          # [1, 34]
    w1_m = w1.reshape(C_MID, C_SE)          # [816, 34]
    b1_r = b1.reshape(1, C_MID)             # [1, 816]
    x_m = x217.reshape(C_MID, HW)           # [816, 196]
    w2_m = w2.reshape(C_OUT, C_MID)         # [136, 816]

    vmem = pl.BlockSpec(memory_space=pltpu.MemorySpace.VMEM)

    bytes_accessed = 4 * (se_row.size + w1_m.size + b1_r.size
                          + x_m.size + w2_m.size + C_OUT * HW)
    cost = pl.CostEstimate(
        flops=2 * C_OUT * C_MID * HW + 2 * C_SE * C_MID + C_OUT * C_MID,
        transcendentals=C_MID,
        bytes_accessed=bytes_accessed)

    out = pl.pallas_call(
        _se_mul_conv_kernel,
        out_shape=jax.ShapeDtypeStruct((C_OUT, HW), jnp.float32),
        in_specs=[vmem, vmem, vmem, vmem, vmem],
        out_specs=vmem,
        cost_estimate=cost,
    )(se_row, w1_m, b1_r, x_m, w2_m)

    return out.reshape(1, C_OUT, H, W)      # free reshape to NCHW


def _reference(x220, x217, w1, b1, w2):
    # pure-JAX reference of the PyTorch forward (1x1 convs == matmuls)
    se = x220.reshape(C_SE)
    gate = jax.nn.sigmoid(w1.reshape(C_MID, C_SE) @ se + b1)        # [816]
    x223 = x217 * gate.reshape(1, C_MID, 1, 1)
    y = jnp.einsum('oc,bchw->bohw', w2.reshape(C_OUT, C_MID), x223)
    return y


if __name__ == "__main__":
    key = jax.random.PRNGKey(0)
    k1, k2, k3, k4, k5 = jax.random.split(key, 5)

    x217 = jax.random.normal(k1, (1, C_MID, H, W), dtype=jnp.float32)
    x220 = jax.random.normal(k2, (1, C_SE, 1, 1), dtype=jnp.float32)

    # deterministic parameter init (shapes from the module's __init__)
    w1 = jax.random.normal(k3, (C_MID, C_SE, 1, 1), dtype=jnp.float32) * 0.1
    b1 = jax.random.normal(k4, (C_MID,), dtype=jnp.float32) * 0.1
    w2 = jax.random.normal(k5, (C_OUT, C_MID, 1, 1), dtype=jnp.float32) * 0.05

    fn = jax.jit(se_mul_conv)
    out = jax.block_until_ready(fn(x220, x217, w1, b1, w2))

    ref = _reference(x220, x217, w1, b1, w2)
    assert out.shape == (1, C_OUT, H, W)
    assert jnp.allclose(out, ref, atol=1e-3, rtol=1e-3)

    print("KERNEL_OK")
</pallas_src>

<mosaic_0001>
module attributes {stable_mosaic.version = 11 : i64} {
  func.func @_se_mul_conv_kernel(%arg0: memref<1x34xf32, #tpu.memory_space<vmem>>, %arg1: memref<816x34xf32, #tpu.memory_space<vmem>>, %arg2: memref<1x816xf32, #tpu.memory_space<vmem>>, %arg3: memref<816x196xf32, #tpu.memory_space<vmem>>, %arg4: memref<136x816xf32, #tpu.memory_space<vmem>>, %arg5: memref<136x196xf32, #tpu.memory_space<vmem>>) attributes {dimension_semantics = [], scalar_prefetch = 0 : i64, scratch_operands = 0 : i64, tpu.core_type = #tpu.core_type<tc>} {
    %c0 = arith.constant 0 : index
    %c0_0 = arith.constant 0 : index
    %0 = vector.load %arg0[%c0, %c0_0] : memref<1x34xf32, #tpu.memory_space<vmem>>, vector<1x34xf32>
    %c0_1 = arith.constant 0 : index
    %c0_2 = arith.constant 0 : index
    %1 = vector.load %arg1[%c0_1, %c0_2] : memref<816x34xf32, #tpu.memory_space<vmem>>, vector<816x34xf32>
    %cst = arith.constant dense<0.000000e+00> : vector<1x816xf32>
    %2 = tpu.matmul %0, %1, %cst {dimension_numbers = #tpu.dot_dimension_numbers<[1], [1], [0], [0], [0, 0, 1, 0], [], []>} : vector<1x34xf32>, vector<816x34xf32>, vector<1x816xf32> -> vector<1x816xf32>
    %c0_3 = arith.constant 0 : index
    %c0_4 = arith.constant 0 : index
    %3 = vector.load %arg2[%c0_3, %c0_4] : memref<1x816xf32, #tpu.memory_space<vmem>>, vector<1x816xf32>
    %4 = arith.addf %2, %3 : vector<1x816xf32>
    %5 = arith.negf %4 : vector<1x816xf32>
    %6 = math.exp %5 : vector<1x816xf32>
    %cst_5 = arith.constant 1.000000e+00 : f32
    %7 = vector.broadcast %cst_5 : f32 to vector<1x816xf32>
    %8 = arith.addf %7, %6 : vector<1x816xf32>
    %9 = arith.divf %7, %8 : vector<1x816xf32>
    %c0_6 = arith.constant 0 : index
    %c0_7 = arith.constant 0 : index
    %10 = vector.load %arg4[%c0_6, %c0_7] : memref<136x816xf32, #tpu.memory_space<vmem>>, vector<136x816xf32>
    %11 = vector.broadcast %9 : vector<1x816xf32> to vector<136x816xf32>
    %12 = arith.mulf %10, %11 : vector<136x816xf32>
    %c0_8 = arith.constant 0 : index
    %c0_9 = arith.constant 0 : index
    %13 = vector.load %arg3[%c0_8, %c0_9] : memref<816x196xf32, #tpu.memory_space<vmem>>, vector<816x196xf32>
    %cst_10 = arith.constant dense<0.000000e+00> : vector<136x196xf32>
    %14 = tpu.matmul %12, %13, %cst_10 {dimension_numbers = #tpu.dot_dimension_numbers<[1], [0], [0], [1], [0, 0, 1, 1], [], []>} : vector<136x816xf32>, vector<816x196xf32>, vector<136x196xf32> -> vector<136x196xf32>
    %c0_11 = arith.constant 0 : index
    %c0_12 = arith.constant 0 : index
    %15 = vector.load %arg5[%c0_11, %c0_12] : memref<136x196xf32, #tpu.memory_space<vmem>>, vector<136x196xf32>
    tpu.vector_store %arg5[%c0_11, %c0_12], %14 {strides = array<i32>} : memref<136x196xf32, #tpu.memory_space<vmem>>, vector<136x196xf32>,
    return
  }
}

</mosaic_0001>

<bundles_post_ra>
// kernel: se_mul_conv.1
= control target key start
LH: loop header
LB: loop body
LE: loop exit
PB: predicated region body
PF: predicated region fallthrough
CT: control target
= control target key end

     0   :  { %vm160_vm0 = vcmask 277504   ;;  %vm2321_vm1 = vmmov 0   ;;  %vm1265_vm2 = vcmask 392192   ;;  %vm1986_vm3 = vcmask 556032   ;;  %s4225_s1 = inlined_call_operand.vmem [shape: f32[816,34], index: 1, kind: input, shape index: {}]   ;;  %s4226_s0 = inlined_call_operand.vmem [shape: f32[1,34], index: 0, kind: input, shape index: {}]   ;;  %s4227_s3 = inlined_call_operand.vmem [shape: f32[816,196], index: 3, kind: input, shape index: {}]   ;;  %s4228_s2 = inlined_call_operand.vmem [shape: f32[1,816], index: 2, kind: input, shape index: {}]   ;;  %s4229_s4 = inlined_call_operand.vmem [shape: f32[136,816], index: 4, kind: input, shape index: {}]   ;;  %s4230_s5 = inlined_call_operand.vmem [shape: f32[136,196], index: 5, kind: output, shape index: {}]  }
   0x1   :  { %v52_v0 = vld [vmem:[%s4225_s1 + $0xf8] sm:$0xff]  ;;  %v51_v4 = vld [vmem:[%s4225_s1 + $0xf0] sm:$0xff]  ;;  %v50_v8 = vld [vmem:[%s4225_s1 + $0xe8] sm:$0xff] }
   0x2   :  { %v84_v1 = vld [vmem:[%s4225_s1 + $0x1f8] sm:$0xff]  ;;  %2154 = vmatprep.subr.msk.mxu0 %vm160_vm0, %v52_v0  ;;  %v83_v5 = vld [vmem:[%s4225_s1 + $0x1f0] sm:$0xff]  ;;  %v82_v9 = vld [vmem:[%s4225_s1 + $0x1e8] sm:$0xff] }
   0x3   :  { %v36_v2 = vld [vmem:[%s4225_s1 + $0x78] sm:$0xff]  ;;  %2188 = vmatprep.subr.msk.mxu1 %vm160_vm0, %v84_v1  ;;  %v35_v6 = vld [vmem:[%s4225_s1 + $0x70] sm:$0xff]  ;;  %v34_v10 = vld [vmem:[%s4225_s1 + $0x68] sm:$0xff] }
   0x4   :  { %v68_v3 = vld [vmem:[%s4225_s1 + $0x178] sm:$0xff]  ;;  %2155 = vmatpush3.xpose.msk.msra.mxu0 %vm160_vm0, %v36_v2  ;;  %v67_v7 = vld [vmem:[%s4225_s1 + $0x170] sm:$0xff]  ;;  %v66_v11 = vld [vmem:[%s4225_s1 + $0x168] sm:$0xff] }
   0x5   :  { %2189 = vmatpush3.xpose.msk.msra.mxu1 %vm160_vm0, %v68_v3  ;;  %2156 = vmatprep.subr.msk.mxu0 %vm160_vm0, %v51_v4  ;;  %v49_v12 = vld [vmem:[%s4225_s1 + $0xe0] sm:$0xff]  ;;  %v48_v16 = vld [vmem:[%s4225_s1 + $0xd8] sm:$0xff]  ;;  %v47_v20 = vld [vmem:[%s4225_s1 + $0xd0] sm:$0xff]  ;;  %v2320_v3 = vmov 0.0  }
   0x6   :  { %2190 = vmatprep.subr.msk.mxu1 %vm160_vm0, %v83_v5  ;;  %v81_v13 = vld [vmem:[%s4225_s1 + $0x1e0] sm:$0xff]  ;;  %v80_v17 = vld [vmem:[%s4225_s1 + $0x1d8] sm:$0xff]  ;;  %v79_v21 = vld [vmem:[%s4225_s1 + $0x1d0] sm:$0xff] }
   0x7   :  { %v33_v14 = vld [vmem:[%s4225_s1 + $0x60] sm:$0xff]  ;;  %v32_v18 = vld [vmem:[%s4225_s1 + $0x58] sm:$0xff]  ;;  %v31_v22 = vld [vmem:[%s4225_s1 + $0x50] sm:$0xff] }
   0x8   :  { %2157 = vmatpush3.xpose.msk.msra.mxu0 %vm160_vm0, %v35_v6  ;;  %v65_v15 = vld [vmem:[%s4225_s1 + $0x160] sm:$0xff]  ;;  %v64_v19 = vld [vmem:[%s4225_s1 + $0x158] sm:$0xff]  ;;  %v63_v23 = vld [vmem:[%s4225_s1 + $0x150] sm:$0xff] }
   0x9   :  { %2191 = vmatpush3.xpose.msk.msra.mxu1 %vm160_vm0, %v67_v7  ;;  %2158 = vmatprep.subr.msk.mxu0 %vm160_vm0, %v50_v8  ;;  %v46_v24 = vld [vmem:[%s4225_s1 + $0xc8] sm:$0xff]  ;;  %v2455_v26 = vld [vmem:[%s4226_s0] sm:$0x1]  ;;  %v44_v33 = vld [vmem:[%s4225_s1 + $0xb8] sm:$0xff] }
   0xa   :  { %2192 = vmatprep.subr.msk.mxu1 %vm160_vm0, %v82_v9  ;;  %v78_v25 = vld [vmem:[%s4225_s1 + $0x1c8] sm:$0xff]  ;;  %v45_v29 = vld [vmem:[%s4225_s1 + $0xc0] sm:$0xff]  ;;  %2186 = vmatprep.mubr.msk.f32.mxu0 %vm160_vm0, %v2455_v26  ;;  %v76_v34 = vld [vmem:[%s4225_s1 + $0x1b8] sm:$0xff] }
   0xb   :  { %v30_v27 = vld [vmem:[%s4225_s1 + $0x48] sm:$0xff]  ;;  %v77_v30 = vld [vmem:[%s4225_s1 + $0x1c0] sm:$0xff]  ;;  %2220 = vmatprep.mubr.msk.f32.mxu1 %vm160_vm0, %v2455_v26  ;;  %v28_v35 = vld [vmem:[%s4225_s1 + $0x38] sm:$0xff] }
   0xc   :  { %2159 = vmatpush3.xpose.msk.msra.mxu0 %vm160_vm0, %v34_v10  ;;  %v62_v28 = vld [vmem:[%s4225_s1 + $0x148] sm:$0xff]  ;;  %v29_v31 = vld [vmem:[%s4225_s1 + $0x40] sm:$0xff]  ;;  %v60_v36 = vld [vmem:[%s4225_s1 + $0x138] sm:$0xff] }
   0xd   :  { %2193 = vmatpush3.xpose.msk.msra.mxu1 %vm160_vm0, %v66_v11  ;;  %2160 = vmatprep.subr.msk.mxu0 %vm160_vm0, %v49_v12  ;;  %v61_v32 = vld [vmem:[%s4225_s1 + $0x140] sm:$0xff]  ;;  %v43_v37 = vld [vmem:[%s4225_s1 + $0xb0] sm:$0xff]  ;;  %v42_v41 = vld [vmem:[%s4225_s1 + $0xa8] sm:$0xff] }
   0xe   :  { %2194 = vmatprep.subr.msk.mxu1 %vm160_vm0, %v81_v13  ;;  %v75_v38 = vld [vmem:[%s4225_s1 + $0x1b0] sm:$0xff]  ;;  %v74_v42 = vld [vmem:[%s4225_s1 + $0x1a8] sm:$0xff]  ;;  %v41_v45 = vld [vmem:[%s4225_s1 + $0xa0] sm:$0xff] }
   0xf   :  { %v27_v39 = vld [vmem:[%s4225_s1 + $0x30] sm:$0xff]  ;;  %v26_v43 = vld [vmem:[%s4225_s1 + $0x28] sm:$0xff]  ;;  %v73_v46 = vld [vmem:[%s4225_s1 + $0x1a0] sm:$0xff] }
  0x10   :  { %2161 = vmatpush3.xpose.msk.msra.mxu0 %vm160_vm0, %v33_v14  ;;  %v59_v40 = vld [vmem:[%s4225_s1 + $0x130] sm:$0xff]  ;;  %v58_v44 = vld [vmem:[%s4225_s1 + $0x128] sm:$0xff]  ;;  %v25_v47 = vld [vmem:[%s4225_s1 + $0x20] sm:$0xff] }
  0x11   :  { %2195 = vmatpush3.xpose.msk.msra.mxu1 %vm160_vm0, %v65_v15  ;;  %2162 = vmatprep.subr.msk.mxu0 %vm160_vm0, %v48_v16  ;;  %v57_v48 = vld [vmem:[%s4225_s1 + $0x120] sm:$0xff]  ;;  %v40_v49 = vld [vmem:[%s4225_s1 + $0x98] sm:$0xff]  ;;  %v39_v53 = vld [vmem:[%s4225_s1 + $0x90] sm:$0xff] }
  0x12   :  { %2196 = vmatprep.subr.msk.mxu1 %vm160_vm0, %v80_v17  ;;  %v72_v50 = vld [vmem:[%s4225_s1 + $0x198] sm:$0xff]  ;;  %v71_v54 = vld [vmem:[%s4225_s1 + $0x190] sm:$0xff]  ;;  %v38_v57 = vld [vmem:[%s4225_s1 + $0x88] sm:$0xff] }
  0x13   :  { %v24_v51 = vld [vmem:[%s4225_s1 + $0x18] sm:$0xff]  ;;  %v23_v55 = vld [vmem:[%s4225_s1 + $0x10] sm:$0xff]  ;;  %v70_v58 = vld [vmem:[%s4225_s1 + $0x188] sm:$0xff] }
  0x14   :  { %2163 = vmatpush3.xpose.msk.msra.mxu0 %vm160_vm0, %v32_v18  ;;  %v56_v52 = vld [vmem:[%s4225_s1 + $0x118] sm:$0xff]  ;;  %v55_v56 = vld [vmem:[%s4225_s1 + $0x110] sm:$0xff]  ;;  %v22_v59 = vld [vmem:[%s4225_s1 + $0x8] sm:$0xff] }
  0x15   :  { %2197 = vmatpush3.xpose.msk.msra.mxu1 %vm160_vm0, %v64_v19  ;;  %2164 = vmatprep.subr.msk.mxu0 %vm160_vm0, %v47_v20  ;;  %v54_v60 = vld [vmem:[%s4225_s1 + $0x108] sm:$0xff]  ;;  %v37_v61 = vld [vmem:[%s4225_s1 + $0x80] sm:$0xff]  ;;  %v116_v1 = vld [vmem:[%s4225_s1 + $0x2f8] sm:$0xff] }
  0x16   :  { %2198 = vmatprep.subr.msk.mxu1 %vm160_vm0, %v79_v21  ;;  %v69_v62 = vld [vmem:[%s4225_s1 + $0x180] sm:$0xff]  ;;  %v100_v2 = vld [vmem:[%s4225_s1 + $0x278] sm:$0xff]  ;;  %v122_v4 = vld [vmem:[%s4225_s1 + $0x328] sm:$0xff] }
  0x17   :  { %v21_v63 = vld [vmem:[%s4225_s1] sm:$0xff]  ;;  %v115_v5 = vld [vmem:[%s4225_s1 + $0x2f0] sm:$0xff]  ;;  %v114_v8 = vld [vmem:[%s4225_s1 + $0x2e8] sm:$0xff] }
  0x18   :  { %2165 = vmatpush3.xpose.msk.msra.mxu0 %vm160_vm0, %v31_v22  ;;  %v53_v0 = vld [vmem:[%s4225_s1 + $0x100] sm:$0xff]  ;;  %v99_v6 = vld [vmem:[%s4225_s1 + $0x270] sm:$0xff]  ;;  %v98_v9 = vld [vmem:[%s4225_s1 + $0x268] sm:$0xff] }
  0x19   :  { %2199 = vmatpush3.xpose.msk.msra.mxu1 %vm160_vm0, %v63_v23  ;;  %2166 = vmatprep.subr.msk.mxu0 %vm160_vm0, %v46_v24  ;;  %v121_v7 = vld [vmem:[%s4225_s1 + $0x320] sm:$0xff]  ;;  %v120_v10 = vld [vmem:[%s4225_s1 + $0x318] sm:$0xff]  ;;  %v119_v13 = vld [vmem:[%s4225_s1 + $0x310] sm:$0xff] }
  0x1a   :  { %2200 = vmatprep.subr.msk.mxu1 %vm160_vm0, %v78_v25  ;;  %v113_v11 = vld [vmem:[%s4225_s1 + $0x2e0] sm:$0xff]  ;;  %v112_v14 = vld [vmem:[%s4225_s1 + $0x2d8] sm:$0xff]  ;;  %v118_v16 = vld [vmem:[%s4225_s1 + $0x308] sm:$0xff] }
  0x1b   :  { %v97_v12 = vld [vmem:[%s4225_s1 + $0x260] sm:$0xff]  ;;  %v96_v15 = vld [vmem:[%s4225_s1 + $0x258] sm:$0xff]  ;;  %v111_v17 = vld [vmem:[%s4225_s1 + $0x2d0] sm:$0xff] }
  0x1c   :  { %2167 = vmatpush3.xpose.msk.msra.mxu0 %vm160_vm0, %v30_v27  ;;  %v95_v18 = vld [vmem:[%s4225_s1 + $0x250] sm:$0xff]  ;;  %v117_v19 = vld [vmem:[%s4225_s1 + $0x300] sm:$0xff]  ;;  %v110_v20 = vld [vmem:[%s4225_s1 + $0x2c8] sm:$0xff] }
  0x1d   :  { %2201 = vmatpush3.xpose.msk.msra.mxu1 %vm160_vm0, %v62_v28  ;;  %2168 = vmatprep.subr.msk.mxu0 %vm160_vm0, %v45_v29  ;;  %v1092_v21 = vld [vmem:[%s4227_s3 + $0xf8] sm:$0xff]  ;;  %v94_v22 = vld [vmem:[%s4225_s1 + $0x248] sm:$0xff]  ;;  %v1091_v23 = vld [vmem:[%s4227_s3 + $0xf0] sm:$0xff] }
  0x1e   :  { %2202 = vmatprep.subr.msk.mxu1 %vm160_vm0, %v77_v30  ;;  %v109_v24 = vld [vmem:[%s4225_s1 + $0x2c0] sm:$0xff]  ;;  %v1090_v25 = vld [vmem:[%s4227_s3 + $0xe8] sm:$0xff]  ;;  %v1088_v28 = vld [vmem:[%s4227_s3 + $0xd8] sm:$0xff] }
  0x1f   :  { %v1089_v27 = vld [vmem:[%s4227_s3 + $0xe0] sm:$0xff]  ;;  %v1087_v30 = vld [vmem:[%s4227_s3 + $0xd0] sm:$0xff] }
  0x20   :  { %2169 = vmatpush3.xpose.msk.msra.mxu0 %vm160_vm0, %v29_v31  ;;  %v93_v29 = vld [vmem:[%s4225_s1 + $0x240] sm:$0xff]  ;;  %v108_v31 = vld [vmem:[%s4225_s1 + $0x2b8] sm:$0xff] }
  0x21   :  { %2203 = vmatpush3.xpose.msk.msra.mxu1 %vm160_vm0, %v61_v32  ;;  %2170 = vmatprep.subr.msk.mxu0 %vm160_vm0, %v44_v33  ;;  %v1086_v32 = vld [vmem:[%s4227_s3 + $0xc8] sm:$0xff]  ;;  %v1085_v33 = vld [vmem:[%s4227_s3 + $0xc0] sm:$0xff] }
  0x22   :  { %2204 = vmatprep.subr.msk.mxu1 %vm160_vm0, %v76_v34  ;;  %v1084_v34 = vld [vmem:[%s4227_s3 + $0xb8] sm:$0xff] }
  0x24   :  { %2171 = vmatpush3.xpose.msk.msra.mxu0 %vm160_vm0, %v28_v35  ;;  %v92_v35 = vld [vmem:[%s4225_s1 + $0x238] sm:$0xff] }
  0x25   :  { %2205 = vmatpush3.xpose.msk.msra.mxu1 %vm160_vm0, %v60_v36  ;;  %2172 = vmatprep.subr.msk.mxu0 %vm160_vm0, %v43_v37  ;;  %v1083_v36 = vld [vmem:[%s4227_s3 + $0xb0] sm:$0xff] }
  0x26   :  { %2206 = vmatprep.subr.msk.mxu1 %vm160_vm0, %v75_v38  ;;  %v107_v37 = vld [vmem:[%s4225_s1 + $0x2b0] sm:$0xff]  ;;  %v1082_v38 = vld [vmem:[%s4227_s3 + $0xa8] sm:$0xff] }
  0x28   :  { %2173 = vmatpush3.xpose.msk.msra.mxu0 %vm160_vm0, %v27_v39  ;;  %v1081_v39 = vld [vmem:[%s4227_s3 + $0xa0] sm:$0xff] }
  0x29   :  { %2207 = vmatpush3.xpose.msk.msra.mxu1 %vm160_vm0, %v59_v40  ;;  %2174 = vmatprep.subr.msk.mxu0 %vm160_vm0, %v42_v41  ;;  %v1080_v40 = vld [vmem:[%s4227_s3 + $0x98] sm:$0xff]  ;;  %v91_v41 = vld [vmem:[%s4225_s1 + $0x230] sm:$0xff] }
  0x2a   :  { %2208 = vmatprep.subr.msk.mxu1 %vm160_vm0, %v74_v42  ;;  %v1079_v42 = vld [vmem:[%s4227_s3 + $0x90] sm:$0xff] }
  0x2c   :  { %2175 = vmatpush3.xpose.msk.msra.mxu0 %vm160_vm0, %v26_v43  ;;  %v106_v43 = vld [vmem:[%s4225_s1 + $0x2a8] sm:$0xff] }
  0x2d   :  { %2209 = vmatpush3.xpose.msk.msra.mxu1 %vm160_vm0, %v58_v44  ;;  %2176 = vmatprep.subr.msk.mxu0 %vm160_vm0, %v41_v45  ;;  %v1078_v44 = vld [vmem:[%s4227_s3 + $0x88] sm:$0xff]  ;;  %v1077_v45 = vld [vmem:[%s4227_s3 + $0x80] sm:$0xff] }
  0x2e   :  { %2210 = vmatprep.subr.msk.mxu1 %vm160_vm0, %v73_v46  ;;  %v1076_v46 = vld [vmem:[%s4227_s3 + $0x78] sm:$0xff] }
  0x30   :  { %2177 = vmatpush3.xpose.msk.msra.mxu0 %vm160_vm0, %v25_v47  ;;  %v90_v47 = vld [vmem:[%s4225_s1 + $0x228] sm:$0xff] }
  0x31   :  { %2211 = vmatpush3.xpose.msk.msra.mxu1 %vm160_vm0, %v57_v48  ;;  %2178 = vmatprep.subr.msk.mxu0 %vm160_vm0, %v40_v49  ;;  %v1075_v48 = vld [vmem:[%s4227_s3 + $0x70] sm:$0xff]  ;;  %v105_v49 = vld [vmem:[%s4225_s1 + $0x2a0] sm:$0xff] }
  0x32   :  { %2212 = vmatprep.subr.msk.mxu1 %vm160_vm0, %v72_v50  ;;  %v1074_v50 = vld [vmem:[%s4227_s3 + $0x68] sm:$0xff] }
  0x34   :  { %2179 = vmatpush3.xpose.msk.msra.mxu0 %vm160_vm0, %v24_v51  ;;  %v1073_v51 = vld [vmem:[%s4227_s3 + $0x60] sm:$0xff] }
  0x35   :  { %2213 = vmatpush3.xpose.msk.msra.mxu1 %vm160_vm0, %v56_v52  ;;  %2180 = vmatprep.subr.msk.mxu0 %vm160_vm0, %v39_v53  ;;  %v1072_v52 = vld [vmem:[%s4227_s3 + $0x58] sm:$0xff]  ;;  %v89_v53 = vld [vmem:[%s4225_s1 + $0x220] sm:$0xff] }
  0x36   :  { %2214 = vmatprep.subr.msk.mxu1 %vm160_vm0, %v71_v54  ;;  %v1071_v54 = vld [vmem:[%s4227_s3 + $0x50] sm:$0xff] }
  0x38   :  { %2181 = vmatpush3.xpose.msk.msra.mxu0 %vm160_vm0, %v23_v55  ;;  %v104_v55 = vld [vmem:[%s4225_s1 + $0x298] sm:$0xff] }
  0x39   :  { %2215 = vmatpush3.xpose.msk.msra.mxu1 %vm160_vm0, %v55_v56  ;;  %2182 = vmatprep.subr.msk.mxu0 %vm160_vm0, %v38_v57  ;;  %v1070_v56 = vld [vmem:[%s4227_s3 + $0x48] sm:$0xff]  ;;  %v88_v57 = vld [vmem:[%s4225_s1 + $0x218] sm:$0xff] }
  0x3a   :  { %2216 = vmatprep.subr.msk.mxu1 %vm160_vm0, %v70_v58  ;;  %v103_v58 = vld [vmem:[%s4225_s1 + $0x290] sm:$0xff] }
  0x3c   :  { %2183 = vmatpush3.xpose.msk.msra.mxu0 %vm160_vm0, %v22_v59  ;;  %v87_v59 = vld [vmem:[%s4225_s1 + $0x210] sm:$0xff] }
  0x3d   :  { %2217 = vmatpush3.xpose.msk.msra.mxu1 %vm160_vm0, %v54_v60  ;;  %2184 = vmatprep.subr.msk.mxu0 %vm160_vm0, %v37_v61  ;;  %v102_v60 = vld [vmem:[%s4225_s1 + $0x288] sm:$0xff] }
  0x3e   :  { %2218 = vmatprep.subr.msk.mxu1 %vm160_vm0, %v69_v62  ;;  %v86_v61 = vld [vmem:[%s4225_s1 + $0x208] sm:$0xff]  ;;  %v101_v62 = vld [vmem:[%s4225_s1 + $0x280] sm:$0xff] }
  0x40   :  { %2185 = vmatpush3.xpose.msk.msra.mxu0 %vm160_vm0, %v21_v63  ;;  %v85_v63 = vld [vmem:[%s4225_s1 + $0x200] sm:$0xff] }
  0x41   :  { %2219 = vmatpush3.xpose.msk.msra.mxu1 %vm160_vm0, %v53_v0  ;;  %2222 = vmatprep.subr.msk.mxu0 %vm160_vm0, %v116_v1  ;;  %v1156_v0 = vld [vmem:[%s4227_s3 + $0x2f8] sm:$0xff]  ;;  %v1155_v1 = vld [vmem:[%s4227_s3 + $0x2f0] sm:$0xff] }
  0x42   :  { %2263 = vmatprep.subr.mxu1 %v2320_v3 }
  0x43   :  { %2187 = vmatmul.mubr.msk.f32.vlgmr.msra.gmra.mxu0 %vm160_vm0, %v2455_v26 }
  0x44   :  { %2221 = vmatmul.mubr.msk.f32.vlgmr.msra.gmra.mxu1 %vm160_vm0, %v2455_v26  ;;  %2223 = vmatpush3.xpose.msk.msra.mxu0 %vm160_vm0, %v100_v2  ;;  %v1154_v2 = vld [vmem:[%s4227_s3 + $0x2e8] sm:$0xff] }
  0x45   :  { %2264 = vmatpush3.xpose.msk.msra.mxu1 %vm160_vm0, %v122_v4  ;;  %2224 = vmatprep.subr.msk.mxu0 %vm160_vm0, %v115_v5  ;;  %v1153_v4 = vld [vmem:[%s4227_s3 + $0x2e0] sm:$0xff] }
  0x46   :  { %2265 = vmatprep.subr.mxu1 %v2320_v3  ;;  %2254 = vmatprep.mubr.msk.f32.mxu0 %vm160_vm0, %v2455_v26  ;;  %v1069_v5 = vld [vmem:[%s4227_s3 + $0x40] sm:$0xff] }
  0x47   :  { %2275 = vmatprep.mubr.msk.f32.mxu1 %vm2321_vm1, %v2320_v3 }
  0x48   :  { %2225 = vmatpush3.xpose.msk.msra.mxu0 %vm160_vm0, %v99_v6  ;;  %v1152_v6 = vld [vmem:[%s4227_s3 + $0x2d8] sm:$0xff] }
  0x49   :  { %2266 = vmatpush3.xpose.msk.msra.mxu1 %vm160_vm0, %v121_v7  ;;  %2226 = vmatprep.subr.msk.mxu0 %vm160_vm0, %v114_v8  ;;  %v1068_v7 = vld [vmem:[%s4227_s3 + $0x38] sm:$0xff]  ;;  %v1150_v8 = vld [vmem:[%s4227_s3 + $0x2c8] sm:$0xff] }
  0x4a   :  { %2267 = vmatprep.subr.mxu1 %v2320_v3 }
  0x4c   :  { %2227 = vmatpush3.xpose.msk.msra.mxu0 %vm160_vm0, %v98_v9  ;;  %v1067_v9 = vld [vmem:[%s4227_s3 + $0x30] sm:$0xff] }
  0x4d   :  { %2268 = vmatpush3.xpose.msk.msra.mxu1 %vm160_vm0, %v120_v10  ;;  %2228 = vmatprep.subr.msk.mxu0 %vm160_vm0, %v113_v11  ;;  %v1149_v10 = vld [vmem:[%s4227_s3 + $0x2c0] sm:$0xff]  ;;  %v1066_v11 = vld [vmem:[%s4227_s3 + $0x28] sm:$0xff] }
  0x4e   :  { %2269 = vmatprep.subr.mxu1 %v2320_v3 }
  0x50   :  { %2229 = vmatpush3.xpose.msk.msra.mxu0 %vm160_vm0, %v97_v12  ;;  %v1148_v12 = vld [vmem:[%s4227_s3 + $0x2b8] sm:$0xff] }
  0x51   :  { %2270 = vmatpush3.xpose.msk.msra.mxu1 %vm160_vm0, %v119_v13  ;;  %2230 = vmatprep.subr.msk.mxu0 %vm160_vm0, %v112_v14  ;;  %v1065_v13 = vld [vmem:[%s4227_s3 + $0x20] sm:$0xff]  ;;  %v1147_v14 = vld [vmem:[%s4227_s3 + $0x2b0] sm:$0xff] }
  0x52   :  { %2271 = vmatprep.subr.mxu1 %v2320_v3 }
  0x54   :  { %2231 = vmatpush3.xpose.msk.msra.mxu0 %vm160_vm0, %v96_v15  ;;  %v1064_v15 = vld [vmem:[%s4227_s3 + $0x18] sm:$0xff] }
  0x55   :  { %2272 = vmatpush3.xpose.msk.msra.mxu1 %vm160_vm0, %v118_v16  ;;  %2232 = vmatprep.subr.msk.mxu0 %vm160_vm0, %v111_v17  ;;  %v1146_v16 = vld [vmem:[%s4227_s3 + $0x2a8] sm:$0xff]  ;;  %v1063_v17 = vld [vmem:[%s4227_s3 + $0x10] sm:$0xff] }
  0x56   :  { %2273 = vmatprep.subr.mxu1 %v2320_v3 }
  0x58   :  { %2233 = vmatpush3.xpose.msk.msra.mxu0 %vm160_vm0, %v95_v18  ;;  %v1145_v18 = vld [vmem:[%s4227_s3 + $0x2a0] sm:$0xff] }
  0x59   :  { %2274 = vmatpush3.xpose.msk.msra.mxu1 %vm160_vm0, %v117_v19  ;;  %2234 = vmatprep.subr.msk.mxu0 %vm160_vm0, %v110_v20  ;;  %v1062_v19 = vld [vmem:[%s4227_s3 + $0x8] sm:$0xff]  ;;  %v1144_v20 = vld [vmem:[%s4227_s3 + $0x298] sm:$0xff] }
  0x5a   :  { %1317 = vmatprep.subr.mxu1 %v1092_v21  ;;  %v1061_v21 = vld [vmem:[%s4227_s3] sm:$0xff] }
  0x5c   :  { %2276 = vmatmul.mubr.msk.f32.vlgmr.msra.gmra.mxu1 %vm160_vm0, %v2455_v26  ;;  %2235 = vmatpush3.xpose.msk.msra.mxu0 %vm160_vm0, %v94_v22  ;;  %v1143_v22 = vld [vmem:[%s4227_s3 + $0x290] sm:$0xff] }
  0x5d   :  { %1318 = vmatpush1.msra.mxu1 %v1091_v23  ;;  %2236 = vmatprep.subr.msk.mxu0 %vm160_vm0, %v109_v24  ;;  %v1124_v23 = vld [vmem:[%s4227_s3 + $0x1f8] sm:$0xff]  ;;  %v1142_v24 = vld [vmem:[%s4227_s3 + $0x288] sm:$0xff] }
  0x5e   :  { %1319 = vmatprep.subr.mxu1 %v1090_v25  ;;  %v1123_v25 = vld [vmem:[%s4227_s3 + $0x1f0] sm:$0xff] }
  0x5f   :  { %1320 = vmatpush1.msra.mxu1 %v1089_v27  ;;  %v1141_v27 = vld [vmem:[%s4227_s3 + $0x280] sm:$0xff] }
  0x60   :  { %1321 = vmatprep.subr.mxu1 %v1088_v28  ;;  %2237 = vmatpush3.xpose.msk.msra.mxu0 %vm160_vm0, %v93_v29  ;;  %v1122_v28 = vld [vmem:[%s4227_s3 + $0x1e8] sm:$0xff]  ;;  %v1140_v29 = vld [vmem:[%s4227_s3 + $0x278] sm:$0xff] }
  0x61   :  { %1322 = vmatpush1.msra.mxu1 %v1087_v30  ;;  %2238 = vmatprep.subr.msk.mxu0 %vm160_vm0, %v108_v31  ;;  %v1121_v30 = vld [vmem:[%s4227_s3 + $0x1e0] sm:$0xff]  ;;  %v1139_v31 = vld [vmem:[%s4227_s3 + $0x270] sm:$0xff] }
  0x62   :  { %1323 = vmatprep.subr.mxu1 %v1086_v32  ;;  %v1120_v32 = vld [vmem:[%s4227_s3 + $0x1d8] sm:$0xff] }
  0x63   :  { %1324 = vmatpush1.msra.mxu1 %v1085_v33  ;;  %v1138_v33 = vld [vmem:[%s4227_s3 + $0x268] sm:$0xff] }
  0x64   :  { %1325 = vmatprep.subr.mxu1 %v1084_v34  ;;  %2239 = vmatpush3.xpose.msk.msra.mxu0 %vm160_vm0, %v92_v35  ;;  %v1119_v34 = vld [vmem:[%s4227_s3 + $0x1d0] sm:$0xff]  ;;  %v1137_v35 = vld [vmem:[%s4227_s3 + $0x260] sm:$0xff] }
  0x65   :  { %1326 = vmatpush1.msra.mxu1 %v1083_v36  ;;  %2240 = vmatprep.subr.msk.mxu0 %vm160_vm0, %v107_v37  ;;  %v1118_v36 = vld [vmem:[%s4227_s3 + $0x1c8] sm:$0xff]  ;;  %v1136_v37 = vld [vmem:[%s4227_s3 + $0x258] sm:$0xff] }
  0x66   :  { %1327 = vmatprep.subr.mxu1 %v1082_v38  ;;  %v1117_v38 = vld [vmem:[%s4227_s3 + $0x1c0] sm:$0xff] }
  0x67   :  { %1328 = vmatpush1.msra.mxu1 %v1081_v39  ;;  %v1135_v39 = vld [vmem:[%s4227_s3 + $0x250] sm:$0xff] }
  0x68   :  { %1329 = vmatprep.subr.mxu1 %v1080_v40  ;;  %2241 = vmatpush3.xpose.msk.msra.mxu0 %vm160_vm0, %v91_v41  ;;  %v1116_v40 = vld [vmem:[%s4227_s3 + $0x1b8] sm:$0xff]  ;;  %v1134_v41 = vld [vmem:[%s4227_s3 + $0x248] sm:$0xff] }
  0x69   :  { %1330 = vmatpush1.msra.mxu1 %v1079_v42  ;;  %2242 = vmatprep.subr.msk.mxu0 %vm160_vm0, %v106_v43  ;;  %v1115_v42 = vld [vmem:[%s4227_s3 + $0x1b0] sm:$0xff]  ;;  %v1133_v43 = vld [vmem:[%s4227_s3 + $0x240] sm:$0xff] }
  0x6a   :  { %1331 = vmatprep.subr.mxu1 %v1078_v44  ;;  %v1114_v44 = vld [vmem:[%s4227_s3 + $0x1a8] sm:$0xff] }
  0x6b   :  { %1332 = vmatpush1.msra.mxu1 %v1077_v45  ;;  %v1132_v45 = vld [vmem:[%s4227_s3 + $0x238] sm:$0xff] }
  0x6c   :  { %1333 = vmatprep.subr.mxu1 %v1076_v46  ;;  %2243 = vmatpush3.xpose.msk.msra.mxu0 %vm160_vm0, %v90_v47  ;;  %v1113_v46 = vld [vmem:[%s4227_s3 + $0x1a0] sm:$0xff]  ;;  %v1131_v47 = vld [vmem:[%s4227_s3 + $0x230] sm:$0xff] }
  0x6d   :  { %1334 = vmatpush1.msra.mxu1 %v1075_v48  ;;  %2244 = vmatprep.subr.msk.mxu0 %vm160_vm0, %v105_v49  ;;  %v1112_v48 = vld [vmem:[%s4227_s3 + $0x198] sm:$0xff]  ;;  %v1130_v49 = vld [vmem:[%s4227_s3 + $0x228] sm:$0xff] }
  0x6e   :  { %1335 = vmatprep.subr.mxu1 %v1074_v50  ;;  %v1111_v50 = vld [vmem:[%s4227_s3 + $0x190] sm:$0xff] }
  0x6f   :  { %1336 = vmatpush1.msra.mxu1 %v1073_v51  ;;  %v1129_v51 = vld [vmem:[%s4227_s3 + $0x220] sm:$0xff] }
  0x70   :  { %1337 = vmatprep.subr.mxu1 %v1072_v52  ;;  %2245 = vmatpush3.xpose.msk.msra.mxu0 %vm160_vm0, %v89_v53  ;;  %v1110_v52 = vld [vmem:[%s4227_s3 + $0x188] sm:$0xff]  ;;  %v1128_v53 = vld [vmem:[%s4227_s3 + $0x218] sm:$0xff] }
  0x71   :  { %1338 = vmatpush1.msra.mxu1 %v1071_v54  ;;  %2246 = vmatprep.subr.msk.mxu0 %vm160_vm0, %v104_v55  ;;  %v1109_v54 = vld [vmem:[%s4227_s3 + $0x180] sm:$0xff]  ;;  %v1127_v55 = vld [vmem:[%s4227_s3 + $0x210] sm:$0xff] }
  0x72   :  { %1339 = vmatprep.subr.mxu1 %v1070_v56  ;;  %v1108_v56 = vld [vmem:[%s4227_s3 + $0x178] sm:$0xff] }
  0x73   :  { %1340 = vmatpush1.msra.mxu1 %v1069_v5  ;;  %v1102_v5 = vld [vmem:[%s4227_s3 + $0x148] sm:$0xff] }
  0x74   :  { %2247 = vmatpush3.xpose.msk.msra.mxu0 %vm160_vm0, %v88_v57  ;;  %1341 = vmatprep.subr.mxu1 %v1068_v7  ;;  %v1126_v57 = vld [vmem:[%s4227_s3 + $0x208] sm:$0xff]  ;;  %v1101_v7 = vld [vmem:[%s4227_s3 + $0x140] sm:$0xff] }
  0x75   :  { %2248 = vmatprep.subr.msk.mxu0 %vm160_vm0, %v103_v58  ;;  %1342 = vmatpush1.msra.mxu1 %v1067_v9  ;;  %v1107_v58 = vld [vmem:[%s4227_s3 + $0x170] sm:$0xff]  ;;  %v1182_v9 = vld [vmem:[%s4227_s3 + $0x3c8] sm:$0xff] }
  0x76   :  { %1343 = vmatprep.subr.mxu1 %v1066_v11  ;;  %v1181_v11 = vld [vmem:[%s4227_s3 + $0x3c0] sm:$0xff] }
  0x77   :  { %1344 = vmatpush1.msra.mxu1 %v1065_v13  ;;  %v1180_v13 = vld [vmem:[%s4227_s3 + $0x3b8] sm:$0xff] }
  0x78   :  { %2249 = vmatpush3.xpose.msk.msra.mxu0 %vm160_vm0, %v87_v59  ;;  %1345 = vmatprep.subr.mxu1 %v1064_v15  ;;  %v1125_v59 = vld [vmem:[%s4227_s3 + $0x200] sm:$0xff]  ;;  %v1179_v15 = vld [vmem:[%s4227_s3 + $0x3b0] sm:$0xff] }
  0x79   :  { %2250 = vmatprep.subr.msk.mxu0 %vm160_vm0, %v102_v60  ;;  %1346 = vmatpush1.msra.mxu1 %v1063_v17  ;;  %v1106_v60 = vld [vmem:[%s4227_s3 + $0x168] sm:$0xff]  ;;  %v1095_v17 = vld [vmem:[%s4227_s3 + $0x110] sm:$0xff] }
  0x7a   :  { %1347 = vmatprep.subr.mxu1 %v1062_v19  ;;  %v1094_v19 = vld [vmem:[%s4227_s3 + $0x108] sm:$0xff] }
  0x7b   :  { %1348 = vmatpush1.msra.mxu1 %v1061_v21  ;;  %v1177_v21 = vld [vmem:[%s4227_s3 + $0x3a0] sm:$0xff] }
  0x7c   :  { %2251 = vmatpush3.xpose.msk.msra.mxu0 %vm160_vm0, %v86_v61  ;;  %1349 = vmatprep.subr.mxu1 %v1124_v23  ;;  %v1188_v61 = vld [vmem:[%s4227_s3 + $0x3f8] sm:$0xff]  ;;  %v1175_v23 = vld [vmem:[%s4227_s3 + $0x390] sm:$0xff] }
  0x7d   :  { %2252 = vmatprep.subr.msk.mxu0 %vm160_vm0, %v101_v62  ;;  %1350 = vmatpush2.msra.mxu1 %v1123_v25  ;;  %v1105_v62 = vld [vmem:[%s4227_s3 + $0x160] sm:$0xff]  ;;  %v1174_v25 = vld [vmem:[%s4227_s3 + $0x388] sm:$0xff] }
  0x7e   :  { %1351 = vmatprep.subr.mxu1 %v1122_v28  ;;  %v1172_v28 = vld [vmem:[%s4227_s3 + $0x378] sm:$0xff] }
  0x7f   :  { %1352 = vmatpush2.msra.mxu1 %v1121_v30  ;;  %v1170_v30 = vld [vmem:[%s4227_s3 + $0x368] sm:$0xff] }
  0x80   :  { %2253 = vmatpush3.xpose.msk.msra.mxu0 %vm160_vm0, %v85_v63  ;;  %1353 = vmatprep.subr.mxu1 %v1120_v32  ;;  %v1187_v63 = vld [vmem:[%s4227_s3 + $0x3f0] sm:$0xff]  ;;  %v1168_v32 = vld [vmem:[%s4227_s3 + $0x358] sm:$0xff] }
  0x81   :  { %1484 = vmatprep.subr.mxu0 %v1156_v0  ;;  %1354 = vmatpush2.msra.mxu1 %v1119_v34  ;;  %v1104_v0 = vld [vmem:[%s4227_s3 + $0x158] sm:$0xff]  ;;  %v1166_v34 = vld [vmem:[%s4227_s3 + $0x348] sm:$0xff] }
  0x82   :  { %1355 = vmatprep.subr.mxu1 %v1118_v36  ;;  %v1164_v36 = vld [vmem:[%s4227_s3 + $0x338] sm:$0xff] }
  0x83   :  { %2255 = vmatmul.mubr.msk.f32.vlgmr.msra.gmra.mxu0 %vm160_vm0, %v2455_v26  ;;  %v1151_v26 = vld [vmem:[%s4227_s3 + $0x2d0] sm:$0xff]  ;;  %1356 = vmatpush2.msra.mxu1 %v1117_v38  ;;  %v1162_v38 = vld [vmem:[%s4227_s3 + $0x328] sm:$0xff] }
  0x84   :  { %1485 = vmatpush1.msra.mxu0 %v1155_v1  ;;  %1357 = vmatprep.subr.mxu1 %v1116_v40  ;;  %v1186_v1 = vld [vmem:[%s4227_s3 + $0x3e8] sm:$0xff]  ;;  %v1160_v40 = vld [vmem:[%s4227_s3 + $0x318] sm:$0xff] }
  0x85   :  { %1486 = vmatprep.subr.mxu0 %v1154_v2  ;;  %1358 = vmatpush2.msra.mxu1 %v1115_v42  ;;  %v1103_v2 = vld [vmem:[%s4227_s3 + $0x150] sm:$0xff]  ;;  %v1158_v42 = vld [vmem:[%s4227_s3 + $0x308] sm:$0xff] }
  0x86   :  { %1487 = vmatpush1.msra.mxu0 %v1153_v4  ;;  %1359 = vmatprep.subr.mxu1 %v1114_v44  ;;  %v1185_v4 = vld [vmem:[%s4227_s3 + $0x3e0] sm:$0xff]  ;;  %v3176_v44 = vld [vmem:[%s4227_s3 + $0x658] sm:$0xff] }
  0x87   :  { %1488 = vmatprep.subr.mxu0 %v1152_v6  ;;  %1360 = vmatpush2.msra.mxu1 %v1113_v46  ;;  %v1184_v6 = vld [vmem:[%s4227_s3 + $0x3d8] sm:$0xff] }
  0x88   :  { %1489 = vmatpush1.msra.mxu0 %v1151_v26  ;;  %1361 = vmatprep.subr.mxu1 %v1112_v48  ;;  %v1183_v26 = vld [vmem:[%s4227_s3 + $0x3d0] sm:$0xff] }
  0x89   :  { %1490 = vmatprep.subr.mxu0 %v1150_v8  ;;  %1362 = vmatpush2.msra.mxu1 %v1111_v50  ;;  %v1100_v8 = vld [vmem:[%s4227_s3 + $0x138] sm:$0xff] }
  0x8a   :  { %1491 = vmatpush1.msra.mxu0 %v1149_v10  ;;  %1363 = vmatprep.subr.mxu1 %v1110_v52  ;;  %v1099_v10 = vld [vmem:[%s4227_s3 + $0x130] sm:$0xff] }
  0x8b   :  { %1492 = vmatprep.subr.mxu0 %v1148_v12  ;;  %1364 = vmatpush2.msra.mxu1 %v1109_v54  ;;  %v1098_v12 = vld [vmem:[%s4227_s3 + $0x128] sm:$0xff] }
  0x8c   :  { %1493 = vmatpush1.msra.mxu0 %v1147_v14  ;;  %1365 = vmatprep.subr.mxu1 %v1108_v56  ;;  %v1097_v14 = vld [vmem:[%s4227_s3 + $0x120] sm:$0xff] }
  0x8d   :  { %1494 = vmatprep.subr.mxu0 %v1146_v16  ;;  %1366 = vmatpush2.msra.mxu1 %v1107_v58  ;;  %v1096_v16 = vld [vmem:[%s4227_s3 + $0x118] sm:$0xff] }
  0x8e   :  { %1495 = vmatpush1.msra.mxu0 %v1145_v18  ;;  %1367 = vmatprep.subr.mxu1 %v1106_v60  ;;  %v1178_v18 = vld [vmem:[%s4227_s3 + $0x3a8] sm:$0xff] }
  0x8f   :  { %1496 = vmatprep.subr.mxu0 %v1144_v20  ;;  %1368 = vmatpush2.msra.mxu1 %v1105_v62  ;;  %v1093_v20 = vld [vmem:[%s4227_s3 + $0x100] sm:$0xff] }
  0x90   :  { %1497 = vmatpush1.msra.mxu0 %v1143_v22  ;;  %1369 = vmatprep.subr.mxu1 %v1104_v0  ;;  %v1176_v22 = vld [vmem:[%s4227_s3 + $0x398] sm:$0xff] }
  0x91   :  { %1498 = vmatprep.subr.mxu0 %v1142_v24  ;;  %1370 = vmatpush2.msra.mxu1 %v1103_v2  ;;  %v1220_v24 = vld [vmem:[%s4227_s3 + $0x4f8] sm:$0xff] }
  0x92   :  { %1499 = vmatpush1.msra.mxu0 %v1141_v27  ;;  %1371 = vmatprep.subr.mxu1 %v1102_v5  ;;  %v1173_v27 = vld [vmem:[%s4227_s3 + $0x380] sm:$0xff] }
  0x93   :  { %1500 = vmatprep.subr.mxu0 %v1140_v29  ;;  %1372 = vmatpush2.msra.mxu1 %v1101_v7  ;;  %v1171_v29 = vld [vmem:[%s4227_s3 + $0x370] sm:$0xff] }
  0x94   :  { %1501 = vmatpush1.msra.mxu0 %v1139_v31  ;;  %1373 = vmatprep.subr.mxu1 %v1100_v8  ;;  %v1169_v31 = vld [vmem:[%s4227_s3 + $0x360] sm:$0xff] }
  0x95   :  { %1502 = vmatprep.subr.mxu0 %v1138_v33  ;;  %1374 = vmatpush2.msra.mxu1 %v1099_v10  ;;  %v1167_v33 = vld [vmem:[%s4227_s3 + $0x350] sm:$0xff] }
  0x96   :  { %1503 = vmatpush1.msra.mxu0 %v1137_v35  ;;  %1375 = vmatprep.subr.mxu1 %v1098_v12  ;;  %v1165_v35 = vld [vmem:[%s4227_s3 + $0x340] sm:$0xff] }
  0x97   :  { %1504 = vmatprep.subr.mxu0 %v1136_v37  ;;  %1376 = vmatpush2.msra.mxu1 %v1097_v14  ;;  %v1163_v37 = vld [vmem:[%s4227_s3 + $0x330] sm:$0xff] }
  0x98   :  { %1505 = vmatpush1.msra.mxu0 %v1135_v39  ;;  %1377 = vmatprep.subr.mxu1 %v1096_v16  ;;  %v1161_v39 = vld [vmem:[%s4227_s3 + $0x320] sm:$0xff] }
  0x99   :  { %1506 = vmatprep.subr.mxu0 %v1134_v41  ;;  %1378 = vmatpush2.msra.mxu1 %v1095_v17  ;;  %v1159_v41 = vld [vmem:[%s4227_s3 + $0x310] sm:$0xff] }
  0x9a   :  { %1507 = vmatpush1.msra.mxu0 %v1133_v43  ;;  %1379 = vmatprep.subr.mxu1 %v1094_v19  ;;  %v1157_v43 = vld [vmem:[%s4227_s3 + $0x300] sm:$0xff]  ;;  %v796_v19 = vld [vmem:[%s4229_s4 + $0x8] sm:$0xff] }
  0x9b   :  { %1508 = vmatprep.subr.mxu0 %v1132_v45  ;;  %1380 = vmatpush2.msra.mxu1 %v1093_v20  ;;  %v125_v45 = vlaneseq  ;;  %v797_v20 = vld [vmem:[%s4229_s4 + $0x10] sm:$0xff] }
  0x9c   :  { %1509 = vmatpush1.msra.mxu0 %v1131_v47  ;;  %1651 = vmatprep.subr.mxu1 %v1220_v24  ;;  %v795_v24 = vld [vmem:[%s4229_s4] sm:$0xff] }
  0x9d   :  { %1510 = vmatprep.subr.mxu0 %v1130_v49  ;;  %v3179_v46 = vshrl.u32 %v125_v45, 7  ;;  %v3188_v49 = vld [vmem:[%s4228_s2] sm:$0x7f] }
  0x9e   :  { %1511 = vmatpush1.msra.mxu0 %v1129_v51 }
  0x9f   :  { %1512 = vmatprep.subr.mxu0 %v1128_v53  ;;  %v3182_v47 = vsub.s32 0, %v3179_v46  ;;  %v135_v48 = vsub.s32 2, %v3179_v46  ;;  %v131_v50 = vsub.s32 1, %v3179_v46  ;;  %v139_v51 = vsub.s32 3, %v3179_v46 }
  0xa0   :  { %1513 = vmatpush1.msra.mxu0 %v1127_v55 }
  0xa1   :  { %1514 = vmatprep.subr.mxu0 %v1126_v57  ;;  %v128_v52 = vrot.slane %v3188_v49, %v3182_v47  ;;  %v136_v53 = vrot.slane %v3188_v49, %v135_v48  ;;  %v132_v54 = vrot.slane %v3188_v49, %v131_v50  ;;  %v140_v55 = vrot.slane %v3188_v49, %v139_v51  ;;  %v811_v50 = vld [vmem:[%s4229_s4 + $0x80] sm:$0xff] }
  0xa2   :  { %1515 = vmatpush1.msra.mxu0 %v1125_v59 }
  0xa3   :  { %1516 = vmatprep.subr.mxu0 %v1188_v61 }
  0xa4   :  { %1517 = vmatpush2.msra.mxu0 %v1187_v63 }
  0xa5   :  { %1518 = vmatprep.subr.mxu0 %v1186_v1 }
  0xa6   :  { %1519 = vmatpush2.msra.mxu0 %v1185_v4 }
  0xa7   :  { %1520 = vmatprep.subr.mxu0 %v1184_v6 }
  0xa8   :  { %1521 = vmatpush2.msra.mxu0 %v1183_v26 }
  0xa9   :  { %1522 = vmatprep.subr.mxu0 %v1182_v9 }
  0xaa   :  { %1523 = vmatpush2.msra.mxu0 %v1181_v11 }
  0xab   :  { %1524 = vmatprep.subr.mxu0 %v1180_v13 }
  0xac   :  { %1525 = vmatpush2.msra.mxu0 %v1179_v15 }
  0xad   :  { %1526 = vmatprep.subr.mxu0 %v1178_v18 }
  0xae   :  { %1527 = vmatpush2.msra.mxu0 %v1177_v21 }
  0xaf   :  { %1528 = vmatprep.subr.mxu0 %v1176_v22 }
  0xb0   :  { %1529 = vmatpush2.msra.mxu0 %v1175_v23  ;;  %v798_v23 = vld [vmem:[%s4229_s4 + $0x18] sm:$0xff] }
  0xb1   :  { %1530 = vmatprep.subr.mxu0 %v1174_v25 }
  0xb2   :  { %1531 = vmatpush2.msra.mxu0 %v1173_v27  ;;  %v805_v27 = vld [vmem:[%s4229_s4 + $0x50] sm:$0xff] }
  0xb3   :  { %1532 = vmatprep.subr.mxu0 %v1172_v28 }
  0xb4   :  { %1533 = vmatpush2.msra.mxu0 %v1171_v29 }
  0xb5   :  { %1534 = vmatprep.subr.mxu0 %v1170_v30  ;;  %v803_v30 = vld [vmem:[%s4229_s4 + $0x40] sm:$0xff] }
  0xb6   :  { %1535 = vmatpush2.msra.mxu0 %v1169_v31 }
  0xb7   :  { %1536 = vmatprep.subr.mxu0 %v1168_v32 }
  0xb8   :  { %1537 = vmatpush2.msra.mxu0 %v1167_v33  ;;  %v1219_v33 = vld [vmem:[%s4227_s3 + $0x4f0] sm:$0xff] }
  0xb9   :  { %1538 = vmatprep.subr.mxu0 %v1166_v34  ;;  %v804_v34 = vld [vmem:[%s4229_s4 + $0x48] sm:$0xff] }
  0xba   :  { %1539 = vmatpush2.msra.mxu0 %v1165_v35  ;;  %v1218_v35 = vld [vmem:[%s4227_s3 + $0x4e8] sm:$0xff] }
  0xbb   :  { %1540 = vmatprep.subr.mxu0 %v1164_v36 }
  0xbc   :  { %1541 = vmatpush2.msra.mxu0 %v1163_v37  ;;  %v802_v37 = vld [vmem:[%s4229_s4 + $0x38] sm:$0xff] }
  0xbd   :  { %1542 = vmatprep.subr.mxu0 %v1162_v38  ;;  %v812_v38 = vld [vmem:[%s4229_s4 + $0x88] sm:$0xff] }
  0xbe   :  { %1543 = vmatpush2.msra.mxu0 %v1161_v39 }
  0xbf   :  { %1544 = vmatprep.subr.mxu0 %v1160_v40  ;;  %v1217_v40 = vld [vmem:[%s4227_s3 + $0x4e0] sm:$0xff] }
  0xc0   :  { %1545 = vmatpush2.msra.mxu0 %v1159_v41  ;;  %v810_v41 = vld [vmem:[%s4229_s4 + $0x78] sm:$0xff] }
  0xc1   :  { %1546 = vmatprep.subr.mxu0 %v1158_v42 }
  0xc2   :  { %1547 = vmatpush2.msra.mxu0 %v1157_v43  ;;  %v1216_v43 = vld [vmem:[%s4227_s3 + $0x4d8] sm:$0xff] }
  0xc3   :  { %1838 = vmatprep.subr.mxu0 %v3176_v44 }
 0x103   :  { %v536_v56 = vpop.f32.mrf.mxu0 }
 0x104   :  { %v607_v57 = vpop.f32.mrf.mxu1  ;;  %v537_v58 = vadd.f32 %v536_v56, %v128_v52  ;;  %v1215_v52 = vld [vmem:[%s4227_s3 + $0x4d0] sm:$0xff]  ;;  %v1213_v56 = vld [vmem:[%s4227_s3 + $0x4c0] sm:$0xff] }
 0x105   :  { %v608_v59 = vadd.f32 %v607_v57, %v136_v53  ;;  %v538_v60 = vpop.f32.mrf.mxu0  ;;  %v1214_v53 = vld [vmem:[%s4227_s3 + $0x4c8] sm:$0xff] }
 0x106   :  { %v609_v61 = vpop.f32.mrf.mxu1  ;;  %v2130_v62 = vmul.f32 -1.442695, %v537_v58  ;;  %v539_v0 = vadd.f32 %v538_v60, %v132_v54  ;;  %v809_v54 = vld [vmem:[%s4229_s4 + $0x70] sm:$0xff]  ;;  %v818_v60 = vld [vmem:[%s4229_s4 + $0xb8] sm:$0xff] }
 0x107   :  { %v2132_v63 = vmul.f32 -1.442695, %v608_v59  ;;  %v610_v1 = vadd.f32 %v609_v61, %v140_v55  ;;  %v819_v55 = vld [vmem:[%s4229_s4 + $0xc0] sm:$0xff]  ;;  %v817_v58 = vld [vmem:[%s4229_s4 + $0xb0] sm:$0xff] }
 0x108   :  { %2292 = vpow2.f32 %v2130_v62  ;;  %v2131_v2 = vmul.f32 -1.442695, %v539_v0  ;;  %v3288_v59 = vld [vmem:[%s4227_s3 + $0x650] sm:$0xff]  ;;  %v1212_v62 = vld [vmem:[%s4227_s3 + $0x4b8] sm:$0xff] }
 0x109   :  { %v2133_v4 = vmul.f32 -1.442695, %v610_v1  ;;  %2294 = vpow2.f32 %v2132_v63  ;;  %v1211_v1 = vld [vmem:[%s4227_s3 + $0x4b0] sm:$0xff] }
 0x10a   :  { %2296 = vpow2.f32 %v2131_v2  ;;  %v816_v2 = vld [vmem:[%s4229_s4 + $0xa8] sm:$0xff] }
 0x10b   :  { %2298 = vpow2.f32 %v2133_v4  ;;  %v1210_v4 = vld [vmem:[%s4227_s3 + $0x4a8] sm:$0xff] }
 0x115   :  { %v2293_v5 = vpop.eup %2292 }
 0x116   :  { %v2295_v6 = vpop.eup %2294  ;;  %v774_v7 = vadd.f32 1.0, %v2293_v5 }
 0x117   :  { %v2297_v26 = vpop.eup %2296  ;;  %v776_v8 = vadd.f32 1.0, %v2295_v6  ;;  %v826_v6 = vld [vmem:[%s4229_s4 + $0xf8] sm:$0xff] }
 0x118   :  { %v2299_v9 = vpop.eup %2298  ;;  %2300 = vrcp.f32 %v774_v7  ;;  %v775_v10 = vadd.f32 1.0, %v2297_v26  ;;  %v3316_v7 = vld [vmem:[%s4227_s3 + $0x648] sm:$0xff]  ;;  %v1209_v26 = vld [vmem:[%s4227_s3 + $0x4a0] sm:$0xff] }
 0x119   :  { %2302 = vrcp.f32 %v776_v8  ;;  %v777_v11 = vadd.f32 1.0, %v2299_v9  ;;  %v824_v8 = vld [vmem:[%s4229_s4 + $0xe8] sm:$0xff]  ;;  %v825_v9 = vld [vmem:[%s4229_s4 + $0xf0] sm:$0xff] }
 0x11a   :  { %2304 = vrcp.f32 %v775_v10  ;;  %v1208_v10 = vld [vmem:[%s4227_s3 + $0x498] sm:$0xff] }
 0x11b   :  { %2306 = vrcp.f32 %v777_v11 }
 0x11c   :  { %v3197_v12 = vpop.f32.mrf.mxu1 }
 0x11e   :  { %v2277_v13 = vpop.f32.mrf.mxu1 }
 0x11f   :  { %v1207_v13 = vld [vmem:[%s4227_s3 + $0x490] sm:$0xff] }
 0x125   :  { %v2301_v14 = vpop.eup %2300 }
 0x126   :  { %v2303_v15 = vpop.eup %2302  ;;  %v3200_v17 = vrot.slane %v2301_v14, %v3182_v47 }
 0x127   :  { %v2305_v16 = vpop.eup %2304  ;;  %v3203_v18 = vrot.slane %v2303_v15, %v3182_v47  ;;  %v151_v15 = vsub.s32 6, %v3179_v46 }
 0x128   :  { %v2307_v21 = vpop.eup %2306  ;;  %v3212_v22 = vrot.slane %v2305_v16, %v3182_v47  ;;  %v942_v32 = vmul.f32 %v3200_v17, %v795_v24  ;;  %v949_v45 = vmul.f32 %v3200_v17, %v802_v37  ;;  %v956_v61 = vmul.f32 %v3200_v17, %v809_v54  ;;  %v1205_v24 = vld [vmem:[%s4227_s3 + $0x480] sm:$0xff]  ;;  %v830_v37 = vld [vmem:[%s4229_s4 + $0x118] sm:$0xff]  ;;  %v1198_v54 = vld [vmem:[%s4227_s3 + $0x448] sm:$0xff] }
 0x129   :  { %v3221_v25 = vrot.slane %v2307_v21, %v3182_v47  ;;  %v944_v29 = vmul.f32 %v3203_v18, %v797_v20  ;;  %v951_v42 = vmul.f32 %v3203_v18, %v804_v34  ;;  %v958_v57 = vmul.f32 %v3203_v18, %v811_v50  ;;  %v823_v20 = vld [vmem:[%s4229_s4 + $0xe0] sm:$0xff]  ;;  %v1199_v50 = vld [vmem:[%s4227_s3 + $0x450] sm:$0xff] }
 0x12a   :  { %v943_v28 = vmul.f32 %v3212_v22, %v796_v19  ;;  %v950_v39 = vmul.f32 %v3212_v22, %v803_v30  ;;  %v957_v51 = vmul.f32 %v3212_v22, %v810_v41  ;;  %v964_v0 = vmul.f32 %v3212_v22, %v817_v58  ;;  %v1206_v19 = vld [vmem:[%s4227_s3 + $0x488] sm:$0xff]  ;;  %v1201_v41 = vld [vmem:[%s4227_s3 + $0x460] sm:$0xff] }
 0x12b   :  { %v945_v31 = vmul.f32 %v3221_v25, %v798_v23  ;;  %v952_v36 = vmul.f32 %v3221_v25, %v805_v27  ;;  %v959_v48 = vmul.f32 %v3221_v25, %v812_v38  ;;  %v966_v63 = vmul.f32 %v3221_v25, %v819_v55  ;;  %v833_v23 = vld [vmem:[%s4229_s4 + $0x130] sm:$0xff]  ;;  %v831_v27 = vld [vmem:[%s4229_s4 + $0x120] sm:$0xff] }
 0x12c   :  { %1381 = vmatprep.mubr.f32.mxu1 %v943_v28  ;;  %v965_v5 = vmul.f32 %v3203_v18, %v818_v60  ;;  %v963_v11 = vmul.f32 %v3200_v17, %v816_v2  ;;  %v973_v14 = vmul.f32 %v3221_v25, %v826_v6  ;;  %v971_v16 = vmul.f32 %v3212_v22, %v824_v8  ;;  %v832_v28 = vld [vmem:[%s4229_s4 + $0x128] sm:$0xff]  ;;  %v837_v55 = vld [vmem:[%s4229_s4 + $0x150] sm:$0xff]  ;;  %v1197_v60 = vld [vmem:[%s4227_s3 + $0x440] sm:$0xff] }
 0x12d   :  { %1548 = vmatprep.mubr.f32.mxu0 %v945_v31  ;;  %1382 = vmatmul.mubr.f32.vlgmr.msra.gmra.mxu1 %v942_v32  ;;  %v972_v21 = vmul.f32 %v3203_v18, %v825_v9  ;;  %v143_v30 = vsub.s32 4, %v3179_v46  ;;  %v970_v31 = vmul.f32 %v3200_v17, %v823_v20  ;;  %v1203_v32 = vld [vmem:[%s4227_s3 + $0x470] sm:$0xff]  ;;  %v152_v34 = vrot.slane %v3188_v49, %v151_v15  ;;  %v1194_v8 = vld [vmem:[%s4227_s3 + $0x428] sm:$0xff]  ;;  %v1192_v20 = vld [vmem:[%s4227_s3 + $0x418] sm:$0xff] }
 0x12e   :  { %1549 = vmatmul.mubr.f32.vlgmr.msra.gmra.mxu0 %v944_v29  ;;  %1652 = vmatpush1.msra.mxu1 %v1219_v33  ;;  %v1204_v29 = vld [vmem:[%s4227_s3 + $0x478] sm:$0xff]  ;;  %v980_v33 = vmul.f32 %v3221_v25, %v833_v23  ;;  %v979_v38 = vmul.f32 %v3203_v18, %v832_v28  ;;  %v1195_v2 = vld [vmem:[%s4227_s3 + $0x430] sm:$0xff]  ;;  %v844_v9 = vld [vmem:[%s4229_s4 + $0x188] sm:$0xff] }
 0x12f   :  { %1387 = vmatprep.mubr.f32.mxu1 %v950_v39  ;;  %1653 = vmatprep.subr.mxu1 %v1218_v35  ;;  %v978_v35 = vmul.f32 %v3212_v22, %v831_v27  ;;  %v840_v39 = vld [vmem:[%s4229_s4 + $0x168] sm:$0xff]  ;;  %v1191_v23 = vld [vmem:[%s4227_s3 + $0x410] sm:$0xff] }
 0x130   :  { %1554 = vmatprep.mubr.f32.mxu0 %v952_v36  ;;  %1654 = vmatpush1.msra.mxu1 %v1217_v40  ;;  %v1202_v36 = vld [vmem:[%s4227_s3 + $0x468] sm:$0xff]  ;;  %v147_v40 = vsub.s32 5, %v3179_v46  ;;  %v1200_v46 = vld [vmem:[%s4227_s3 + $0x458] sm:$0xff] }
 0x131   :  { %1388 = vmatmul.mubr.f32.gmra.mxu1 %v949_v45  ;;  %1655 = vmatprep.subr.mxu1 %v1216_v43  ;;  %v839_v43 = vld [vmem:[%s4229_s4 + $0x160] sm:$0xff]  ;;  %v144_v45 = vrot.slane %v3188_v49, %v143_v30  ;;  %v852_v15 = vld [vmem:[%s4229_s4 + $0x1c8] sm:$0xff] }
 0x132   :  { %1555 = vmatmul.mubr.f32.gmra.mxu0 %v951_v42  ;;  %1393 = vmatprep.mubr.f32.mxu1 %v957_v51  ;;  %v838_v42 = vld [vmem:[%s4229_s4 + $0x158] sm:$0xff]  ;;  %v987_v51 = vmul.f32 %v3221_v25, %v840_v39  ;;  %v999_v27 = vmul.f32 %v3212_v22, %v852_v15  ;;  %v1190_v28 = vld [vmem:[%s4227_s3 + $0x408] sm:$0xff] }
 0x133   :  { %1656 = vmatpush1.msra.mxu1 %v1215_v52  ;;  %1560 = vmatprep.mubr.f32.mxu0 %v959_v48  ;;  %v977_v48 = vmul.f32 %v3200_v17, %v830_v37  ;;  %v750_v52 = vadd.f32 %v3197_v12, %v152_v34  ;;  %v847_v12 = vld [vmem:[%s4229_s4 + $0x1a0] sm:$0xff]  ;;  %v860_v34 = vld [vmem:[%s4229_s4 + $0x208] sm:$0xff] }
 0x134   :  { %1657 = vmatprep.subr.mxu1 %v1214_v53  ;;  %1839 = vmatpush1.msra.mxu0 %v3288_v59  ;;  %v985_v53 = vmul.f32 %v3212_v22, %v838_v42  ;;  %v1007_v42 = vmul.f32 %v3203_v18, %v860_v34  ;;  %v1238_v34 = vld [vmem:[%s4227_s3 + $0x588] sm:$0xff] }
 0x135   :  { %1658 = vmatpush1.msra.mxu1 %v1213_v56  ;;  %1840 = vmatprep.subr.mxu0 %v3316_v7  ;;  %v986_v56 = vmul.f32 %v3203_v18, %v839_v43  ;;  %v1250_v43 = vld [vmem:[%s4227_s3 + $0x5e8] sm:$0xff] }
 0x136   :  { %1394 = vmatmul.mubr.f32.gmra.mxu1 %v956_v61  ;;  %1561 = vmatmul.mubr.f32.gmra.mxu0 %v958_v57  ;;  %v148_v57 = vrot.slane %v3188_v49, %v147_v40  ;;  %v845_v61 = vld [vmem:[%s4229_s4 + $0x190] sm:$0xff] }
 0x137   :  { %1659 = vmatprep.subr.mxu1 %v1212_v62  ;;  %1399 = vmatprep.mubr.f32.mxu1 %v964_v0  ;;  %v846_v62 = vld [vmem:[%s4229_s4 + $0x198] sm:$0xff]  ;;  %v984_v0 = vmul.f32 %v3200_v17, %v837_v55  ;;  %v992_v6 = vmul.f32 %v3212_v22, %v845_v61  ;;  %v1247_v55 = vld [vmem:[%s4227_s3 + $0x5d0] sm:$0xff] }
 0x138   :  { %1660 = vmatpush1.msra.mxu1 %v1211_v1  ;;  %1566 = vmatprep.mubr.f32.mxu0 %v966_v63  ;;  %v1196_v63 = vld [vmem:[%s4227_s3 + $0x438] sm:$0xff] }
 0x139   :  { %1661 = vmatprep.subr.mxu1 %v1210_v4  ;;  %v994_v4 = vmul.f32 %v3221_v25, %v847_v12  ;;  %v1246_v12 = vld [vmem:[%s4227_s3 + $0x5c8] sm:$0xff] }
 0x13a   :  { %1662 = vmatpush1.msra.mxu1 %v1209_v26  ;;  %1567 = vmatmul.mubr.f32.gmra.mxu0 %v965_v5  ;;  %v2136_v5 = vmul.f32 -1.442695, %v750_v52  ;;  %v865_v52 = vld [vmem:[%s4229_s4 + $0x230] sm:$0xff] }
 0x13b   :  { %1400 = vmatmul.mubr.f32.gmra.mxu1 %v963_v11  ;;  %1663 = vmatprep.subr.mxu1 %v1208_v10  ;;  %v993_v10 = vmul.f32 %v3203_v18, %v846_v62  ;;  %v854_v11 = vld [vmem:[%s4229_s4 + $0x1d8] sm:$0xff]  ;;  %v1012_v61 = vmul.f32 %v3200_v17, %v865_v52 }
 0x13c   :  { %1405 = vmatprep.mubr.f32.mxu1 %v971_v16  ;;  %1664 = vmatpush1.msra.mxu1 %v1207_v13  ;;  %v853_v16 = vld [vmem:[%s4229_s4 + $0x1d0] sm:$0xff]  ;;  %2308 = vpow2.f32 %v2136_v5  ;;  %v3549_v5 = vld [vmem:[%s4227_s3 + $0x638] sm:$0xff] }
 0x13d   :  { %1665 = vmatprep.subr.mxu1 %v1206_v19  ;;  %1572 = vmatprep.mubr.f32.mxu0 %v973_v14  ;;  %v1193_v14 = vld [vmem:[%s4227_s3 + $0x420] sm:$0xff]  ;;  %v1000_v30 = vmul.f32 %v3203_v18, %v853_v16  ;;  %v881_v16 = vld [vmem:[%s4229_s4 + $0x2b0] sm:$0xff] }
 0x13e   :  { %1666 = vmatpush1.msra.mxu1 %v1205_v24  ;;  %1573 = vmatmul.mubr.f32.gmra.mxu0 %v972_v21  ;;  %v991_v21 = vmul.f32 %v3200_v17, %v844_v9  ;;  %v1001_v24 = vmul.f32 %v3221_v25, %v854_v11  ;;  %v882_v9 = vld [vmem:[%s4229_s4 + $0x2b8] sm:$0xff] }
 0x13f   :  { %1406 = vmatmul.mubr.f32.gmra.mxu1 %v970_v31  ;;  %1667 = vmatprep.subr.mxu1 %v1204_v29  ;;  %v851_v29 = vld [vmem:[%s4229_s4 + $0x1c0] sm:$0xff]  ;;  %v861_v31 = vld [vmem:[%s4229_s4 + $0x210] sm:$0xff] }
 0x140   :  { %1411 = vmatprep.mubr.f32.mxu1 %v978_v35  ;;  %1668 = vmatpush1.msra.mxu1 %v1203_v32  ;;  %v1189_v32 = vld [vmem:[%s4227_s3 + $0x400] sm:$0xff]  ;;  %v1252_v35 = vld [vmem:[%s4227_s3 + $0x5f8] sm:$0xff]  ;;  %v998_v37 = vmul.f32 %v3200_v17, %v851_v29  ;;  %v1008_v39 = vmul.f32 %v3221_v25, %v861_v31  ;;  %v1239_v31 = vld [vmem:[%s4227_s3 + $0x590] sm:$0xff] }
 0x141   :  { %1578 = vmatprep.mubr.f32.mxu0 %v980_v33  ;;  %1669 = vmatprep.subr.mxu1 %v1202_v36  ;;  %v859_v33 = vld [vmem:[%s4229_s4 + $0x200] sm:$0xff]  ;;  %v868_v36 = vld [vmem:[%s4229_s4 + $0x248] sm:$0xff]  ;;  %v1240_v29 = vld [vmem:[%s4227_s3 + $0x598] sm:$0xff] }
 0x142   :  { %1579 = vmatmul.mubr.f32.gmra.mxu0 %v979_v38  ;;  %1670 = vmatpush1.msra.mxu1 %v1201_v41  ;;  %v1251_v38 = vld [vmem:[%s4227_s3 + $0x5f0] sm:$0xff]  ;;  %v1006_v40 = vmul.f32 %v3212_v22, %v859_v33  ;;  %v858_v41 = vld [vmem:[%s4229_s4 + $0x1f8] sm:$0xff]  ;;  %v887_v33 = vld [vmem:[%s4229_s4 + $0x2e0] sm:$0xff] }
 0x143   :  { %1412 = vmatmul.mubr.f32.gmra.mxu1 %v977_v48  ;;  %1671 = vmatprep.subr.mxu1 %v1200_v46  ;;  %v678_v58 = vpop.f32.mrf.mxu0  ;;  %v866_v46 = vld [vmem:[%s4229_s4 + $0x238] sm:$0xff]  ;;  %v1249_v48 = vld [vmem:[%s4227_s3 + $0x5e0] sm:$0xff] }
 0x144   :  { %1417 = vmatprep.mubr.f32.mxu1 %v985_v53  ;;  %1672 = vmatpush1.msra.mxu1 %v1199_v50  ;;  %v679_v49 = vadd.f32 %v678_v58, %v144_v45  ;;  %v1015_v45 = vmul.f32 %v3221_v25, %v868_v36  ;;  %v1005_v50 = vmul.f32 %v3200_v17, %v858_v41  ;;  %v867_v53 = vld [vmem:[%s4229_s4 + $0x240] sm:$0xff]  ;;  %v873_v58 = vld [vmem:[%s4229_s4 + $0x270] sm:$0xff]  ;;  %v888_v36 = vld [vmem:[%s4229_s4 + $0x2e8] sm:$0xff] }
 0x145   :  { %1584 = vmatprep.mubr.f32.mxu0 %v987_v51  ;;  %1673 = vmatprep.subr.mxu1 %v1198_v54  ;;  %v680_v1 = vpop.f32.mrf.mxu0  ;;  %v1248_v51 = vld [vmem:[%s4227_s3 + $0x5d8] sm:$0xff]  ;;  %v1013_v54 = vmul.f32 %v3212_v22, %v866_v46  ;;  %v1035_v46 = vmul.f32 %v3203_v18, %v888_v36  ;;  %v1222_v36 = vld [vmem:[%s4227_s3 + $0x508] sm:$0xff] }
 0x146   :  { %1585 = vmatmul.mubr.f32.gmra.mxu0 %v986_v56  ;;  %1674 = vmatpush1.msra.mxu1 %v1197_v60  ;;  %v681_v26 = vadd.f32 %v680_v1, %v148_v57  ;;  %v2134_v13 = vmul.f32 -1.442695, %v679_v49  ;;  %v875_v56 = vld [vmem:[%s4229_s4 + $0x280] sm:$0xff]  ;;  %v1014_v60 = vmul.f32 %v3203_v18, %v867_v53  ;;  %v1020_v1 = vmul.f32 %v3212_v22, %v873_v58  ;;  %v1236_v41 = vld [vmem:[%s4227_s3 + $0x578] sm:$0xff] }
 0x147   :  { %1418 = vmatmul.mubr.f32.gmra.mxu1 %v984_v0  ;;  %1675 = vmatprep.subr.mxu1 %v1196_v63  ;;  %v3521_v57 = vld [vmem:[%s4227_s3 + $0x640] sm:$0xff]  ;;  %v1022_v62 = vmul.f32 %v3221_v25, %v875_v56  ;;  %v874_v63 = vld [vmem:[%s4229_s4 + $0x278] sm:$0xff] }
 0x148   :  { %1423 = vmatprep.mubr.f32.mxu1 %v992_v6  ;;  %v2135_v19 = vmul.f32 -1.442695, %v681_v26  ;;  %1676 = vmatpush1.msra.mxu1 %v1195_v2  ;;  %v1245_v49 = vld [vmem:[%s4227_s3 + $0x5c0] sm:$0xff]  ;;  %v1244_v2 = vld [vmem:[%s4227_s3 + $0x5b8] sm:$0xff]  ;;  %v1243_v26 = vld [vmem:[%s4227_s3 + $0x5b0] sm:$0xff] }
 0x149   :  { %1590 = vmatprep.mubr.f32.mxu0 %v994_v4  ;;  %1677 = vmatprep.subr.mxu1 %v1194_v8  ;;  %v2309_v0 = vpop.eup %2308  ;;  %v872_v4 = vld [vmem:[%s4229_s4 + $0x268] sm:$0xff]  ;;  %v1233_v53 = vld [vmem:[%s4227_s3 + $0x560] sm:$0xff]  ;;  %v1232_v56 = vld [vmem:[%s4227_s3 + $0x558] sm:$0xff] }
 0x14a   :  { %2310 = vpow2.f32 %v2135_v19  ;;  %1591 = vmatmul.mubr.f32.gmra.mxu0 %v993_v10  ;;  %1678 = vmatpush1.msra.mxu1 %v1193_v14  ;;  %v880_v8 = vld [vmem:[%s4229_s4 + $0x2a8] sm:$0xff]  ;;  %v1019_v15 = vmul.f32 %v3200_v17, %v872_v4  ;;  %v780_v19 = vadd.f32 1.0, %v2309_v0 }
 0x14b   :  { %2312 = vpow2.f32 %v2134_v13  ;;  %1424 = vmatmul.mubr.f32.gmra.mxu1 %v991_v21  ;;  %1679 = vmatprep.subr.mxu1 %v1192_v20  ;;  %v1021_v13 = vmul.f32 %v3203_v18, %v874_v63  ;;  %v1242_v14 = vld [vmem:[%s4227_s3 + $0x5a8] sm:$0xff]  ;;  %v1027_v20 = vmul.f32 %v3212_v22, %v880_v8  ;;  %v1029_v21 = vmul.f32 %v3221_v25, %v882_v9  ;;  %v902_v63 = vld [vmem:[%s4229_s4 + $0x358] sm:$0xff] }
 0x14c   :  { %1429 = vmatprep.mubr.f32.mxu1 %v999_v27  ;;  %1680 = vmatpush1.msra.mxu1 %v1191_v23  ;;  %v1241_v23 = vld [vmem:[%s4227_s3 + $0x5a0] sm:$0xff]  ;;  %v3580_v27 = vld [vmem:[%s4227_s3 + $0x630] sm:$0xff]  ;;  %v900_v8 = vld [vmem:[%s4229_s4 + $0x348] sm:$0xff]  ;;  %v1049_v9 = vmul.f32 %v3203_v18, %v902_v63 }
 0x14d   :  { %1596 = vmatprep.mubr.f32.mxu0 %v1001_v24  ;;  %1681 = vmatprep.subr.mxu1 %v1190_v28  ;;  %v889_v24 = vld [vmem:[%s4229_s4 + $0x2f0] sm:$0xff]  ;;  %v827_v63 = vld [vmem:[%s4229_s4 + $0x100] sm:$0xff] }
 0x14e   :  { %1597 = vmatmul.mubr.f32.gmra.mxu0 %v1000_v30  ;;  %1682 = vmatpush1.msra.mxu1 %v1189_v32  ;;  %v879_v30 = vld [vmem:[%s4229_s4 + $0x2a0] sm:$0xff]  ;;  %v1028_v32 = vmul.f32 %v3203_v18, %v881_v16  ;;  %v1047_v16 = vmul.f32 %v3200_v17, %v900_v8 }
 0x14f   :  { %1430 = vmatmul.mubr.f32.gmra.mxu1 %v998_v37  ;;  %1683 = vmatprep.subr.mxu1 %v1252_v35  ;;  %v1036_v35 = vmul.f32 %v3221_v25, %v889_v24  ;;  %v1026_v37 = vmul.f32 %v3200_v17, %v879_v30  ;;  %v3701_v24 = vld [vmem:[%s4227_s3 + $0x628] sm:$0xff] }
 0x150   :  { %1435 = vmatprep.mubr.f32.mxu1 %v1006_v40  ;;  %1684 = vmatpush2.msra.mxu1 %v1251_v38  ;;  %v1237_v38 = vld [vmem:[%s4227_s3 + $0x580] sm:$0xff]  ;;  %v1034_v40 = vmul.f32 %v3212_v22, %v887_v33 }
 0x151   :  { %1602 = vmatprep.mubr.f32.mxu0 %v1008_v39  ;;  %1685 = vmatprep.subr.mxu1 %v1250_v43  ;;  %v896_v39 = vld [vmem:[%s4229_s4 + $0x328] sm:$0xff]  ;;  %v1235_v43 = vld [vmem:[%s4227_s3 + $0x570] sm:$0xff] }
 0x152   :  { %1603 = vmatmul.mubr.f32.gmra.mxu0 %v1007_v42  ;;  %1686 = vmatpush2.msra.mxu1 %v1249_v48  ;;  %v886_v42 = vld [vmem:[%s4229_s4 + $0x2d8] sm:$0xff]  ;;  %v1043_v48 = vmul.f32 %v3221_v25, %v896_v39  ;;  %v1221_v39 = vld [vmem:[%s4227_s3 + $0x500] sm:$0xff] }
 0x153   :  { %1436 = vmatmul.mubr.f32.gmra.mxu1 %v1005_v50  ;;  %1608 = vmatprep.mubr.f32.mxu0 %v1015_v45  ;;  %v894_v45 = vld [vmem:[%s4229_s4 + $0x318] sm:$0xff]  ;;  %v1234_v50 = vld [vmem:[%s4227_s3 + $0x568] sm:$0xff]  ;;  %v1033_v52 = vmul.f32 %v3200_v17, %v886_v42 }
 0x154   :  { %1441 = vmatprep.mubr.f32.mxu1 %v1013_v54  ;;  %1687 = vmatprep.subr.mxu1 %v1248_v51  ;;  %v895_v51 = vld [vmem:[%s4229_s4 + $0x320] sm:$0xff] }
 0x155   :  { %1688 = vmatpush2.msra.mxu1 %v1247_v55  ;;  %1841 = vmatpush1.msra.mxu0 %v3521_v57  ;;  %v903_v54 = vld [vmem:[%s4229_s4 + $0x360] sm:$0xff]  ;;  %v1041_v55 = vmul.f32 %v3212_v22, %v894_v45  ;;  %v1042_v58 = vmul.f32 %v3203_v18, %v895_v51  ;;  %v808_v45 = vld [vmem:[%s4229_s4 + $0x68] sm:$0xff]  ;;  %v814_v51 = vld [vmem:[%s4229_s4 + $0x98] sm:$0xff] }
 0x156   :  { %1609 = vmatmul.mubr.f32.gmra.mxu0 %v1014_v60  ;;  %1689 = vmatprep.subr.mxu1 %v1246_v12  ;;  %v893_v12 = vld [vmem:[%s4229_s4 + $0x310] sm:$0xff] }
 0x157   :  { %v2311_v6 = vpop.eup %2310  ;;  %1442 = vmatmul.mubr.f32.gmra.mxu1 %v1012_v61  ;;  %1614 = vmatprep.mubr.f32.mxu0 %v1022_v62  ;;  %v1231_v60 = vld [vmem:[%s4227_s3 + $0x550] sm:$0xff]  ;;  %v1050_v62 = vmul.f32 %v3221_v25, %v903_v54  ;;  %v1040_v0 = vmul.f32 %v3200_v17, %v893_v12 }
 0x158   :  { %v2313_v10 = vpop.eup %2312  ;;  %v779_v11 = vadd.f32 1.0, %v2311_v6  ;;  %1447 = vmatprep.mubr.f32.mxu1 %v1020_v1  ;;  %1690 = vmatpush2.msra.mxu1 %v1245_v49  ;;  %v901_v61 = vld [vmem:[%s4229_s4 + $0x350] sm:$0xff]  ;;  %v1230_v49 = vld [vmem:[%s4227_s3 + $0x548] sm:$0xff]  ;;  %v1229_v1 = vld [vmem:[%s4227_s3 + $0x540] sm:$0xff] }
 0x159   :  { %1691 = vmatprep.subr.mxu1 %v1244_v2  ;;  %1842 = vmatprep.subr.mxu0 %v3549_v5  ;;  %v778_v28 = vadd.f32 1.0, %v2313_v10  ;;  %v910_v2 = vld [vmem:[%s4229_s4 + $0x398] sm:$0xff]  ;;  %v1048_v6 = vmul.f32 %v3212_v22, %v901_v61  ;;  %v1227_v10 = vld [vmem:[%s4227_s3 + $0x530] sm:$0xff]  ;;  %v828_v61 = vld [vmem:[%s4229_s4 + $0x108] sm:$0xff] }
 0x15a   :  { %2314 = vrcp.f32 %v779_v11  ;;  %1692 = vmatpush2.msra.mxu1 %v1243_v26  ;;  %1615 = vmatmul.mubr.f32.gmra.mxu0 %v1021_v13  ;;  %v1228_v26 = vld [vmem:[%s4227_s3 + $0x538] sm:$0xff]  ;;  %v908_v11 = vld [vmem:[%s4229_s4 + $0x388] sm:$0xff]  ;;  %v1057_v13 = vmul.f32 %v3221_v25, %v910_v2  ;;  %v909_v25 = vld [vmem:[%s4229_s4 + $0x390] sm:$0xff] }
 0x15b   :  { %1448 = vmatmul.mubr.f32.gmra.mxu1 %v1019_v15  ;;  %1693 = vmatprep.subr.mxu1 %v1242_v14  ;;  %2316 = vrcp.f32 %v780_v19  ;;  %v1226_v14 = vld [vmem:[%s4227_s3 + $0x528] sm:$0xff]  ;;  %v1225_v19 = vld [vmem:[%s4227_s3 + $0x520] sm:$0xff] }
 0x15c   :  { %1453 = vmatprep.mubr.f32.mxu1 %v1027_v20  ;;  %1620 = vmatprep.mubr.f32.mxu0 %v1029_v21  ;;  %2318 = vrcp.f32 %v778_v28  ;;  %v907_v20 = vld [vmem:[%s4229_s4 + $0x380] sm:$0xff]  ;;  %v1224_v28 = vld [vmem:[%s4227_s3 + $0x518] sm:$0xff]  ;;  %v836_v2 = vld [vmem:[%s4229_s4 + $0x148] sm:$0xff] }
 0x15d   :  { %1694 = vmatpush2.msra.mxu1 %v1241_v23  ;;  %1843 = vmatpush1.msra.mxu0 %v3580_v27  ;;  %v1055_v23 = vmul.f32 %v3212_v22, %v908_v11  ;;  %v3712_v22 = vld [vmem:[%s4227_s3 + $0x620] sm:$0xff] }
 0x15e   :  { %1695 = vmatprep.subr.mxu1 %v1240_v29  ;;  %1621 = vmatmul.mubr.f32.gmra.mxu0 %v1028_v32  ;;  %v800_v29 = vld [vmem:[%s4229_s4 + $0x28] sm:$0xff]  ;;  %v1054_v32 = vmul.f32 %v3200_v17, %v907_v20  ;;  %v850_v20 = vld [vmem:[%s4229_s4 + $0x1b8] sm:$0xff] }
 0x15f   :  { %1696 = vmatpush2.msra.mxu1 %v1239_v31  ;;  %1626 = vmatprep.mubr.f32.mxu0 %v1036_v35  ;;  %v1223_v31 = vld [vmem:[%s4227_s3 + $0x510] sm:$0xff]  ;;  %v3726_v35 = vld [vmem:[%s4227_s3 + $0x618] sm:$0xff] }
 0x160   :  { %1454 = vmatmul.mubr.f32.gmra.mxu1 %v1026_v37  ;;  %1697 = vmatprep.subr.mxu1 %v1238_v34  ;;  %v1056_v34 = vmul.f32 %v3203_v18, %v909_v25  ;;  %v3739_v18 = vld [vmem:[%s4227_s3 + $0x610] sm:$0xff] }
 0x161   :  { %1459 = vmatprep.mubr.f32.mxu1 %v1034_v40  ;;  %1698 = vmatpush2.msra.mxu1 %v1237_v38  ;;  %v801_v38 = vld [vmem:[%s4229_s4 + $0x30] sm:$0xff]  ;;  %v799_v40 = vld [vmem:[%s4229_s4 + $0x20] sm:$0xff] }
 0x162   :  { %1699 = vmatprep.subr.mxu1 %v1236_v41  ;;  %1627 = vmatmul.mubr.f32.gmra.mxu0 %v1035_v46  ;;  %v3759_v41 = vld [vmem:[%s4227_s3 + $0x600] sm:$0xff] }
 0x163   :  { %1700 = vmatpush2.msra.mxu1 %v1235_v43  ;;  %1632 = vmatprep.mubr.f32.mxu0 %v1043_v48  ;;  %v807_v43 = vld [vmem:[%s4229_s4 + $0x60] sm:$0xff]  ;;  %v806_v48 = vld [vmem:[%s4229_s4 + $0x58] sm:$0xff] }
 0x164   :  { %1460 = vmatmul.mubr.f32.gmra.mxu1 %v1033_v52  ;;  %1701 = vmatprep.subr.mxu1 %v1234_v50 }
 0x165   :  { %1465 = vmatprep.mubr.f32.mxu1 %v1041_v55  ;;  %1702 = vmatpush2.msra.mxu1 %v1233_v53  ;;  %v815_v53 = vld [vmem:[%s4229_s4 + $0xa0] sm:$0xff]  ;;  %v813_v55 = vld [vmem:[%s4229_s4 + $0x90] sm:$0xff] }
 0x166   :  { %1703 = vmatprep.subr.mxu1 %v1232_v56  ;;  %1633 = vmatmul.mubr.f32.gmra.mxu0 %v1042_v58 }
 0x167   :  { %v2315_v4 = vpop.eup %2314  ;;  %1704 = vmatpush2.msra.mxu1 %v1231_v60  ;;  %1638 = vmatprep.mubr.f32.mxu0 %v1050_v62  ;;  %v820_v60 = vld [vmem:[%s4229_s4 + $0xc8] sm:$0xff] }
 0x168   :  { %1466 = vmatmul.mubr.f32.gmra.mxu1 %v1040_v0  ;;  %1705 = vmatprep.subr.mxu1 %v1230_v49  ;;  %v3685_v15 = vrot.slane %v2315_v4, %v3182_v47  ;;  %v2317_v21 = vpop.eup %2316  ;;  %v829_v49 = vld [vmem:[%s4229_s4 + $0x110] sm:$0xff]  ;;  %v835_v0 = vld [vmem:[%s4229_s4 + $0x140] sm:$0xff] }
 0x169   :  { %1471 = vmatprep.mubr.f32.mxu1 %v1048_v6  ;;  %1706 = vmatpush2.msra.mxu1 %v1229_v1  ;;  %v2319_v30 = vpop.eup %2318  ;;  %v3719_v33 = vrot.slane %v2317_v21, %v3182_v47  ;;  %v834_v6 = vld [vmem:[%s4229_s4 + $0x138] sm:$0xff]  ;;  %v848_v21 = vld [vmem:[%s4229_s4 + $0x1a8] sm:$0xff] }
 0x16a   :  { %1707 = vmatprep.subr.mxu1 %v1228_v26  ;;  %1639 = vmatmul.mubr.f32.gmra.mxu0 %v1049_v9  ;;  %v947_v37 = vmul.f32 %v3685_v15, %v800_v29  ;;  %v3733_v17 = vrot.slane %v2319_v30, %v3182_v47  ;;  %v3750_v47 = vld [vmem:[%s4227_s3 + $0x608] sm:$0xff]  ;;  %v954_v50 = vmul.f32 %v3685_v15, %v807_v43  ;;  %v842_v26 = vld [vmem:[%s4229_s4 + $0x178] sm:$0xff]  ;;  %v857_v29 = vld [vmem:[%s4229_s4 + $0x1f0] sm:$0xff] }
 0x16b   :  { %1708 = vmatpush2.msra.mxu1 %v1227_v10  ;;  %1644 = vmatprep.mubr.f32.mxu0 %v1057_v13  ;;  %v948_v42 = vmul.f32 %v3719_v33, %v801_v38  ;;  %v961_v54 = vmul.f32 %v3685_v15, %v814_v51  ;;  %v962_v56 = vmul.f32 %v3719_v33, %v815_v53  ;;  %v843_v10 = vld [vmem:[%s4229_s4 + $0x180] sm:$0xff]  ;;  %v841_v13 = vld [vmem:[%s4229_s4 + $0x170] sm:$0xff]  ;;  %v884_v51 = vld [vmem:[%s4229_s4 + $0x2c8] sm:$0xff] }
 0x16c   :  { %1472 = vmatmul.mubr.f32.gmra.mxu1 %v1047_v16  ;;  %1709 = vmatprep.subr.mxu1 %v1226_v14  ;;  %v946_v46 = vmul.f32 %v3733_v17, %v799_v40  ;;  %v953_v52 = vmul.f32 %v3733_v17, %v806_v48  ;;  %v960_v12 = vmul.f32 %v3733_v17, %v813_v55  ;;  %v849_v14 = vld [vmem:[%s4229_s4 + $0x1b0] sm:$0xff]  ;;  %v876_v48 = vld [vmem:[%s4229_s4 + $0x288] sm:$0xff]  ;;  %v891_v55 = vld [vmem:[%s4229_s4 + $0x300] sm:$0xff] }
 0x16d   :  { %1477 = vmatprep.mubr.f32.mxu1 %v1055_v23  ;;  %1710 = vmatpush2.msra.mxu1 %v1225_v19  ;;  %v967_v62 = vmul.f32 %v3733_v17, %v820_v60  ;;  %v976_v1 = vmul.f32 %v3719_v33, %v829_v49  ;;  %v982_v4 = vmul.f32 %v3685_v15, %v835_v0  ;;  %v856_v23 = vld [vmem:[%s4229_s4 + $0x1e8] sm:$0xff] }
 0x16e   :  { %1844 = vmatprep.subr.mxu0 %v3701_v24  ;;  %1711 = vmatprep.subr.mxu1 %v1224_v28  ;;  %v983_v8 = vmul.f32 %v3719_v33, %v836_v2  ;;  %v981_v9 = vmul.f32 %v3733_v17, %v834_v6  ;;  %v989_v11 = vmul.f32 %v3685_v15, %v842_v26 }
 0x16f   :  { %1845 = vmatpush1.msra.mxu0 %v3712_v22  ;;  %1712 = vmatpush2.msra.mxu1 %v1223_v31  ;;  %v990_v16 = vmul.f32 %v3719_v33, %v843_v10  ;;  %v988_v19 = vmul.f32 %v3733_v17, %v841_v13  ;;  %v996_v25 = vmul.f32 %v3685_v15, %v849_v14  ;;  %v863_v31 = vld [vmem:[%s4229_s4 + $0x220] sm:$0xff] }
 0x170   :  { %1478 = vmatmul.mubr.f32.gmra.mxu1 %v1054_v32  ;;  %1645 = vmatmul.mubr.f32.gmra.mxu0 %v1056_v34  ;;  %v995_v28 = vmul.f32 %v3733_v17, %v848_v21  ;;  %v1003_v30 = vmul.f32 %v3685_v15, %v856_v23  ;;  %v1004_v32 = vmul.f32 %v3719_v33, %v857_v29 }
 0x171   :  { %1846 = vmatprep.subr.mxu0 %v3726_v35  ;;  %1713 = vmatprep.subr.mxu1 %v1222_v36  ;;  %v1010_v36 = vmul.f32 %v3685_v15, %v863_v31  ;;  %v1031_v53 = vmul.f32 %v3685_v15, %v884_v51 }
 0x172   :  { %1715 = vmatprep.mubr.f32.mxu1 %v947_v37  ;;  %1847 = vmatpush1.msra.mxu0 %v3739_v18  ;;  %v862_v37 = vld [vmem:[%s4229_s4 + $0x218] sm:$0xff] }
 0x173   :  { %1714 = vmatpush2.msra.mxu1 %v1221_v39  ;;  %1848 = vmatprep.subr.mxu0 %v3750_v47  ;;  %v1009_v39 = vmul.f32 %v3733_v17, %v862_v37 }
 0x174   :  { %2278 = vmatprep.subr.mxu1 %v3176_v44  ;;  %1849 = vmatpush1.msra.mxu0 %v3759_v41  ;;  %v955_v44 = vmul.f32 %v3719_v33, %v808_v45 }
 0x175   :  { %1882 = vmatprep.mubr.f32.mxu0 %v2320_v3  ;;  %1716 = vmatmul.mubr.f32.vlgmr.msra.gmra.mxu1 %v946_v46 }
 0x176   :  { %2284 = vmatpush1.msra.mxu1 %v3288_v59  ;;  %2137 = vmatmul.mubr.msk.f32.vlgmr.msra.gmra.mxu0 %vm1265_vm2, %v948_v42  ;;  %v821_v59 = vld [vmem:[%s4229_s4 + $0xd0] sm:$0xff] }
 0x177   :  { %1721 = vmatprep.mubr.f32.mxu1 %v954_v50  ;;  %1888 = vmatprep.mubr.f32.mxu0 %v2320_v3  ;;  %v968_v58 = vmul.f32 %v3685_v15, %v821_v59  ;;  %v877_v42 = vld [vmem:[%s4229_s4 + $0x290] sm:$0xff]  ;;  %v878_v50 = vld [vmem:[%s4229_s4 + $0x298] sm:$0xff] }
 0x178   :  { %2279 = vmatprep.subr.mxu1 %v3316_v7  ;;  %v822_v7 = vld [vmem:[%s4229_s4 + $0xd8] sm:$0xff]  ;;  %v1024_v45 = vmul.f32 %v3685_v15, %v877_v42 }
 0x179   :  { %1722 = vmatmul.mubr.f32.gmra.mxu1 %v953_v52  ;;  %v1025_v52 = vmul.f32 %v3719_v33, %v878_v50 }
 0x17a   :  { %2138 = vmatmul.mubr.msk.f32.gmra.mxu0 %vm1265_vm2, %v955_v44  ;;  %1727 = vmatprep.mubr.f32.mxu1 %v961_v54  ;;  %v1023_v44 = vmul.f32 %v3733_v17, %v876_v48  ;;  %v883_v54 = vld [vmem:[%s4229_s4 + $0x2c0] sm:$0xff] }
 0x17b   :  { %1894 = vmatprep.mubr.f32.mxu0 %v2320_v3  ;;  %2285 = vmatpush1.msra.mxu1 %v3521_v57  ;;  %v969_v57 = vmul.f32 %v3719_v33, %v822_v7  ;;  %v1030_v59 = vmul.f32 %v3733_v17, %v883_v54  ;;  %v898_v7 = vld [vmem:[%s4229_s4 + $0x338] sm:$0xff] }
 0x17c   :  { %2280 = vmatprep.subr.mxu1 %v3549_v5  ;;  %v975_v5 = vmul.f32 %v3685_v15, %v828_v61  ;;  %v1045_v60 = vmul.f32 %v3685_v15, %v898_v7  ;;  %v897_v61 = vld [vmem:[%s4229_s4 + $0x330] sm:$0xff] }
 0x17d   :  { %1728 = vmatmul.mubr.f32.gmra.mxu1 %v960_v12  ;;  %v890_v12 = vld [vmem:[%s4229_s4 + $0x2f8] sm:$0xff] }
 0x17e   :  { %2139 = vmatmul.mubr.msk.f32.gmra.mxu0 %vm1265_vm2, %v962_v56  ;;  %1733 = vmatprep.mubr.f32.mxu1 %v968_v58  ;;  %v1038_v56 = vmul.f32 %v3685_v15, %v891_v55  ;;  %v1037_v58 = vmul.f32 %v3733_v17, %v890_v12 }
 0x17f   :  { %1900 = vmatprep.mubr.f32.mxu0 %v2320_v3  ;;  %2286 = vmatpush1.msra.mxu1 %v3580_v27  ;;  %v974_v27 = vmul.f32 %v3733_v17, %v827_v63  ;;  %v912_v63 = vld [vmem:[%s4229_s4 + $0x3a8] sm:$0xff] }
 0x180   :  { %2281 = vmatprep.subr.mxu1 %v3701_v24  ;;  %v997_v24 = vmul.f32 %v3719_v33, %v850_v20 }
 0x181   :  { %1734 = vmatmul.mubr.f32.gmra.mxu1 %v967_v62  ;;  %v1044_v62 = vmul.f32 %v3733_v17, %v897_v61 }
 0x182   :  { %2140 = vmatmul.mubr.msk.f32.gmra.mxu0 %vm1265_vm2, %v969_v57  ;;  %1739 = vmatprep.mubr.f32.mxu1 %v975_v5  ;;  %v905_v57 = vld [vmem:[%s4229_s4 + $0x370] sm:$0xff]  ;;  %v904_v5 = vld [vmem:[%s4229_s4 + $0x368] sm:$0xff] }
 0x183   :  { %1906 = vmatprep.mubr.f32.mxu0 %v2320_v3  ;;  %2287 = vmatpush1.msra.mxu1 %v3712_v22  ;;  %v855_v22 = vld [vmem:[%s4229_s4 + $0x1e0] sm:$0xff]  ;;  %v1052_v49 = vmul.f32 %v3685_v15, %v905_v57  ;;  %v1051_v0 = vmul.f32 %v3733_v17, %v904_v5 }
 0x184   :  { %2282 = vmatprep.subr.mxu1 %v3726_v35  ;;  %v1002_v34 = vmul.f32 %v3733_v17, %v855_v22  ;;  %v864_v35 = vld [vmem:[%s4229_s4 + $0x228] sm:$0xff] }
 0x185   :  { %1740 = vmatmul.mubr.f32.gmra.mxu1 %v974_v27  ;;  %v1011_v38 = vmul.f32 %v3719_v33, %v864_v35  ;;  %v911_v27 = vld [vmem:[%s4229_s4 + $0x3a0] sm:$0xff] }
 0x186   :  { %2141 = vmatmul.mubr.msk.f32.gmra.mxu0 %vm1265_vm2, %v976_v1  ;;  %1745 = vmatprep.mubr.f32.mxu1 %v982_v4  ;;  %v1059_v1 = vmul.f32 %v3685_v15, %v912_v63  ;;  %v1058_v2 = vmul.f32 %v3733_v17, %v911_v27  ;;  %v885_v4 = vld [vmem:[%s4229_s4 + $0x2d0] sm:$0xff] }
 0x187   :  { %1912 = vmatprep.mubr.f32.mxu0 %v2320_v3  ;;  %2288 = vmatpush1.msra.mxu1 %v3739_v18  ;;  %v870_v18 = vld [vmem:[%s4229_s4 + $0x258] sm:$0xff]  ;;  %v1032_v6 = vmul.f32 %v3719_v33, %v885_v4 }
 0x188   :  { %2283 = vmatprep.subr.mxu1 %v3750_v47  ;;  %v871_v47 = vld [vmem:[%s4229_s4 + $0x260] sm:$0xff]  ;;  %v1017_v40 = vmul.f32 %v3685_v15, %v870_v18  ;;  %v892_v15 = vld [vmem:[%s4229_s4 + $0x308] sm:$0xff] }
 0x189   :  { %1746 = vmatmul.mubr.f32.gmra.mxu1 %v981_v9  ;;  %v1018_v43 = vmul.f32 %v3719_v33, %v871_v47  ;;  %v1039_v26 = vmul.f32 %v3719_v33, %v892_v15  ;;  %v906_v9 = vld [vmem:[%s4229_s4 + $0x378] sm:$0xff] }
 0x18a   :  { %2142 = vmatmul.mubr.msk.f32.gmra.mxu0 %vm1265_vm2, %v983_v8  ;;  %1751 = vmatprep.mubr.f32.mxu1 %v989_v11  ;;  %v1053_v10 = vmul.f32 %v3719_v33, %v906_v9  ;;  %v913_v11 = vld [vmem:[%s4229_s4 + $0x3b0] sm:$0xff] }
 0x18b   :  { %1918 = vmatprep.mubr.f32.mxu0 %v2320_v3  ;;  %2289 = vmatpush1.msra.mxu1 %v3759_v41  ;;  %v869_v41 = vld [vmem:[%s4229_s4 + $0x250] sm:$0xff]  ;;  %v1060_v13 = vmul.f32 %v3719_v33, %v913_v11 }
 0x18c   :  { %v1016_v46 = vmul.f32 %v3733_v17, %v869_v41  ;;  %v899_v17 = vld [vmem:[%s4229_s4 + $0x340] sm:$0xff] }
 0x18d   :  { %1752 = vmatmul.mubr.f32.gmra.mxu1 %v988_v19  ;;  %v1046_v8 = vmul.f32 %v3719_v33, %v899_v17 }
 0x18e   :  { %2143 = vmatmul.mubr.msk.f32.gmra.mxu0 %vm1265_vm2, %v990_v16  ;;  %1757 = vmatprep.mubr.f32.mxu1 %v996_v25 }
 0x18f   :  { %1924 = vmatprep.mubr.f32.mxu0 %v2320_v3 }
 0x191   :  { %1758 = vmatmul.mubr.f32.gmra.mxu1 %v995_v28 }
 0x192   :  { %2144 = vmatmul.mubr.msk.f32.gmra.mxu0 %vm1265_vm2, %v997_v24  ;;  %1763 = vmatprep.mubr.f32.mxu1 %v1003_v30 }
 0x193   :  { %1930 = vmatprep.mubr.f32.mxu0 %v2320_v3 }
 0x195   :  { %1764 = vmatmul.mubr.f32.gmra.mxu1 %v1002_v34 }
 0x196   :  { %2145 = vmatmul.mubr.msk.f32.gmra.mxu0 %vm1265_vm2, %v1004_v32  ;;  %1769 = vmatprep.mubr.f32.mxu1 %v1010_v36 }
 0x197   :  { %1936 = vmatprep.mubr.f32.mxu0 %v2320_v3 }
 0x199   :  { %1770 = vmatmul.mubr.f32.gmra.mxu1 %v1009_v39 }
 0x19a   :  { %2146 = vmatmul.mubr.msk.f32.gmra.mxu0 %vm1265_vm2, %v1011_v38  ;;  %1775 = vmatprep.mubr.f32.mxu1 %v1017_v40 }
 0x19b   :  { %1942 = vmatprep.mubr.f32.mxu0 %v2320_v3 }
 0x19d   :  { %1776 = vmatmul.mubr.f32.gmra.mxu1 %v1016_v46 }
 0x19e   :  { %2147 = vmatmul.mubr.msk.f32.gmra.mxu0 %vm1265_vm2, %v1018_v43  ;;  %1781 = vmatprep.mubr.f32.mxu1 %v1024_v45 }
 0x19f   :  { %1948 = vmatprep.mubr.f32.mxu0 %v2320_v3 }
 0x1a1   :  { %1782 = vmatmul.mubr.f32.gmra.mxu1 %v1023_v44 }
 0x1a2   :  { %2148 = vmatmul.mubr.msk.f32.gmra.mxu0 %vm1265_vm2, %v1025_v52  ;;  %1787 = vmatprep.mubr.f32.mxu1 %v1031_v53 }
 0x1a5   :  { %1788 = vmatmul.mubr.f32.gmra.mxu1 %v1030_v59 }
 0x1a6   :  { %1793 = vmatprep.mubr.f32.mxu1 %v1038_v56 }
 0x1a9   :  { %1794 = vmatmul.mubr.f32.gmra.mxu1 %v1037_v58 }
 0x1aa   :  { %1799 = vmatprep.mubr.f32.mxu1 %v1045_v60 }
 0x1ad   :  { %1800 = vmatmul.mubr.f32.gmra.mxu1 %v1044_v62 }
 0x1ae   :  { %1805 = vmatprep.mubr.f32.mxu1 %v1052_v49 }
 0x1b1   :  { %1806 = vmatmul.mubr.f32.gmra.mxu1 %v1051_v0 }
 0x1b2   :  { %1811 = vmatprep.mubr.f32.mxu1 %v1059_v1 }
 0x1b5   :  { %1812 = vmatmul.mubr.f32.gmra.mxu1 %v1058_v2 }
 0x1b6   :  { %1954 = vmatprep.mubr.f32.mxu1 %v2320_v3 }
 0x1b9   :  { %2149 = vmatmul.mubr.msk.f32.vlgmr.msra.gmra.mxu1 %vm1265_vm2, %v1032_v6 }
 0x1ba   :  { %1960 = vmatprep.mubr.f32.mxu1 %v2320_v3 }
 0x1bd   :  { %2150 = vmatmul.mubr.msk.f32.gmra.mxu1 %vm1265_vm2, %v1039_v26 }
 0x1be   :  { %1966 = vmatprep.mubr.f32.mxu1 %v2320_v3 }
 0x1c1   :  { %2151 = vmatmul.mubr.msk.f32.gmra.mxu1 %vm1265_vm2, %v1046_v8 }
 0x1c2   :  { %1972 = vmatprep.mubr.f32.mxu1 %v2320_v3 }
 0x1c5   :  { %2152 = vmatmul.mubr.msk.f32.gmra.mxu1 %vm1265_vm2, %v1053_v10 }
 0x1c6   :  { %1978 = vmatprep.mubr.f32.mxu1 %v2320_v3 }
 0x1c9   :  { %2153 = vmatmul.mubr.msk.f32.gmra.mxu1 %vm1265_vm2, %v1060_v13 }
 0x1ed   :  { %v1383_v14 = vpop.f32.mrf.mxu1 }
 0x1ee   :  { %v1550_v16 = vpop.f32.mrf.mxu0 }
 0x1ef   :  { %v4004_v19 = vadd.f32 %v1550_v16, %v1383_v14  ;;  %v1385_v20 = vpop.f32.mrf.mxu1 }
 0x1f0   :  { %v1552_v25 = vpop.f32.mrf.mxu0 }
 0x1f1   :  { %v4006_v21 = vadd.f32 %v1552_v25, %v1385_v20  ;;  %v1389_v23 = vpop.f32.mrf.mxu1 }
 0x1f2   :  { %v1556_v24 = vpop.f32.mrf.mxu0 }
 0x1f3   :  { %v4008_v28 = vadd.f32 %v1556_v24, %v1389_v23  ;;  %v1391_v29 = vpop.f32.mrf.mxu1 }
 0x1f4   :  { %v1558_v30 = vpop.f32.mrf.mxu0 }
 0x1f5   :  { %v4010_v22 = vadd.f32 %v1558_v30, %v1391_v29 }
 0x1f6   :  { %v1395_v3 = vpop.f32.mrf.mxu1  ;;  %v1562_v33 = vpop.f32.mrf.mxu0 }
 0x1f7   :  { %v4012_v31 = vadd.f32 %v1562_v33, %v1395_v3 }
 0x1f8   :  { %v1397_v32 = vpop.f32.mrf.mxu1  ;;  %v1564_v34 = vpop.f32.mrf.mxu0 }
 0x1f9   :  { %v4014_v35 = vadd.f32 %v1564_v34, %v1397_v32 }
 0x1fa   :  { %v1568_v36 = vpop.f32.mrf.mxu0 }
 0x1fb   :  { %v1401_v37 = vpop.f32.mrf.mxu1 }
 0x1fc   :  { %v4016_v18 = vadd.f32 %v1568_v36, %v1401_v37  ;;  %v1570_v38 = vpop.f32.mrf.mxu0 }
 0x1fd   :  { %v1403_v39 = vpop.f32.mrf.mxu1 }
 0x1fe   :  { %v4018_v47 = vadd.f32 %v1570_v38, %v1403_v39  ;;  %v1574_v40 = vpop.f32.mrf.mxu0 }
 0x1ff   :  { %v1407_v41 = vpop.f32.mrf.mxu1 }
 0x200   :  { %v4020_v42 = vadd.f32 %v1574_v40, %v1407_v41  ;;  %v1576_v43 = vpop.f32.mrf.mxu0 }
 0x201   :  { %v1409_v46 = vpop.f32.mrf.mxu1 }
 0x202   :  { %v4022_v45 = vadd.f32 %v1576_v43, %v1409_v46  ;;  %v1580_v48 = vpop.f32.mrf.mxu0 }
 0x203   :  { %v1413_v50 = vpop.f32.mrf.mxu1 }
 0x204   :  { %v4024_v51 = vadd.f32 %v1580_v48, %v1413_v50  ;;  %v1582_v44 = vpop.f32.mrf.mxu0 }
 0x205   :  { %v1415_v52 = vpop.f32.mrf.mxu1 }
 0x206   :  { %v4026_v53 = vadd.f32 %v1582_v44, %v1415_v52  ;;  %v1586_v54 = vpop.f32.mrf.mxu0 }
 0x207   :  { %v1419_v55 = vpop.f32.mrf.mxu1 }
 0x208   :  { %v4028_v59 = vadd.f32 %v1586_v54, %v1419_v55  ;;  %v1588_v56 = vpop.f32.mrf.mxu0 }
 0x209   :  { %v1421_v12 = vpop.f32.mrf.mxu1 }
 0x20a   :  { %v4030_v7 = vadd.f32 %v1588_v56, %v1421_v12  ;;  %v1592_v58 = vpop.f32.mrf.mxu0 }
 0x20b   :  { %v1425_v60 = vpop.f32.mrf.mxu1 }
 0x20c   :  { %v4032_v61 = vadd.f32 %v1592_v58, %v1425_v60  ;;  %v1594_v57 = vpop.f32.mrf.mxu0 }
 0x20d   :  { %v1427_v62 = vpop.f32.mrf.mxu1 }
 0x20e   :  { %v4034_v49 = vadd.f32 %v1594_v57, %v1427_v62  ;;  %v1598_v5 = vpop.f32.mrf.mxu0 }
 0x20f   :  { %v1431_v63 = vpop.f32.mrf.mxu1 }
 0x210   :  { %v4036_v0 = vadd.f32 %v1598_v5, %v1431_v63  ;;  %v1600_v1 = vpop.f32.mrf.mxu0 }
 0x211   :  { %v1433_v27 = vpop.f32.mrf.mxu1 }
 0x212   :  { %v4038_v2 = vadd.f32 %v1600_v1, %v1433_v27  ;;  %v1604_v4 = vpop.f32.mrf.mxu0 }
 0x213   :  { %v1437_v6 = vpop.f32.mrf.mxu1 }
 0x214   :  { %v4040_v15 = vadd.f32 %v1604_v4, %v1437_v6  ;;  %v1606_v26 = vpop.f32.mrf.mxu0 }
 0x215   :  { %v1439_v17 = vpop.f32.mrf.mxu1 }
 0x216   :  { %v4042_v8 = vadd.f32 %v1606_v26, %v1439_v17  ;;  %v1610_v9 = vpop.f32.mrf.mxu0 }
 0x217   :  { %v1443_v10 = vpop.f32.mrf.mxu1 }
 0x218   :  { %v4044_v11 = vadd.f32 %v1610_v9, %v1443_v10  ;;  %v1612_v13 = vpop.f32.mrf.mxu0 }
 0x219   :  { %v1445_v14 = vpop.f32.mrf.mxu1 }
 0x21a   :  { %v4046_v16 = vadd.f32 %v1612_v13, %v1445_v14  ;;  %v1616_v20 = vpop.f32.mrf.mxu0 }
 0x21b   :  { %v1449_v25 = vpop.f32.mrf.mxu1 }
 0x21c   :  { %v4048_v23 = vadd.f32 %v1616_v20, %v1449_v25  ;;  %v1618_v24 = vpop.f32.mrf.mxu0 }
 0x21d   :  { %v1451_v29 = vpop.f32.mrf.mxu1 }
 0x21e   :  { %v4050_v30 = vadd.f32 %v1618_v24, %v1451_v29  ;;  %v1622_v3 = vpop.f32.mrf.mxu0 }
 0x220   :  { %v1455_v33 = vpop.f32.mrf.mxu1  ;;  %v1624_v32 = vpop.f32.mrf.mxu0 }
 0x221   :  { %v4052_v34 = vadd.f32 %v1622_v3, %v1455_v33 }
 0x222   :  { %v1457_v36 = vpop.f32.mrf.mxu1  ;;  %v1628_v37 = vpop.f32.mrf.mxu0 }
 0x223   :  { %v4054_v38 = vadd.f32 %v1624_v32, %v1457_v36 }
 0x224   :  { %v1461_v39 = vpop.f32.mrf.mxu1  ;;  %v1630_v40 = vpop.f32.mrf.mxu0 }
 0x225   :  { %v4056_v41 = vadd.f32 %v1628_v37, %v1461_v39 }
 0x226   :  { %v1463_v43 = vpop.f32.mrf.mxu1  ;;  %v1634_v46 = vpop.f32.mrf.mxu0 }
 0x227   :  { %v4058_v48 = vadd.f32 %v1630_v40, %v1463_v43 }
 0x228   :  { %v1467_v50 = vpop.f32.mrf.mxu1  ;;  %v1636_v44 = vpop.f32.mrf.mxu0 }
 0x229   :  { %v4060_v52 = vadd.f32 %v1634_v46, %v1467_v50 }
 0x22a   :  { %v1469_v54 = vpop.f32.mrf.mxu1  ;;  %v1640_v55 = vpop.f32.mrf.mxu0 }
 0x22b   :  { %v4062_v56 = vadd.f32 %v1636_v44, %v1469_v54 }
 0x22c   :  { %v1473_v12 = vpop.f32.mrf.mxu1  ;;  %v1642_v58 = vpop.f32.mrf.mxu0 }
 0x22d   :  { %v4064_v60 = vadd.f32 %v1640_v55, %v1473_v12 }
 0x22e   :  { %v1475_v57 = vpop.f32.mrf.mxu1 }
 0x22f   :  { %v4066_v62 = vadd.f32 %v1642_v58, %v1475_v57 }
 0x230   :  { %v1479_v5 = vpop.f32.mrf.mxu1  ;;  %v1646_v63 = vpop.f32.mrf.mxu0 }
 0x231   :  { %v4068_v1 = vadd.f32 %v1646_v63, %v1479_v5 }
 0x232   :  { %v1481_v27 = vpop.f32.mrf.mxu1  ;;  %v1648_v4 = vpop.f32.mrf.mxu0 }
 0x233   :  { %v4070_v6 = vadd.f32 %v1648_v4, %v1481_v27 }
 0x235   :  { %v1717_v26 = vpop.f32.mrf.mxu1 }
 0x236   :  { %v1718_v17 = vadd.f32 %v1717_v26, %v4004_v19  ;;  %v1884_v9 = vpop.f32.mrf.mxu0 }
 0x237   :  { %v1719_v10 = vpop.f32.mrf.mxu1 }
 0x238   :  { %v1885_v13 = vadd.f32 %v1884_v9, %v1718_v17  ;;  %v1720_v14 = vadd.f32 %v1719_v10, %v4006_v21  ;;  %v1886_v20 = vpop.f32.mrf.mxu0 }
 0x239   :  { %v1723_v25 = vpop.f32.mrf.mxu1 }
 0x23a   :  { %1985 = vst [vmem:[%s4230_s5] sm:$0xff] %v1885_v13  ;;  %v1887_v24 = vadd.f32 %v1886_v20, %v1720_v14  ;;  %v1724_v29 = vadd.f32 %v1723_v25, %v4008_v28  ;;  %v1890_v3 = vpop.f32.mrf.mxu0 }
 0x23b   :  { %v1725_v33 = vpop.f32.mrf.mxu1 }
 0x23c   :  { %1987 = vst.msk [vmem:[%s4230_s5 + $0x8] sm:$0xff] %vm1986_vm3, %v1887_v24  ;;  %v1891_v19 = vadd.f32 %v1890_v3, %v1724_v29  ;;  %v1726_v21 = vadd.f32 %v1725_v33, %v4010_v22  ;;  %v1892_v32 = vpop.f32.mrf.mxu0 }
 0x23d   :  { %v1729_v36 = vpop.f32.mrf.mxu1 }
 0x23e   :  { %1988 = vst [vmem:[%s4230_s5 + $0x10] sm:$0xff] %v1891_v19  ;;  %v1893_v37 = vadd.f32 %v1892_v32, %v1726_v21  ;;  %v1730_v39 = vadd.f32 %v1729_v36, %v4012_v31  ;;  %v1896_v28 = vpop.f32.mrf.mxu0 }
 0x23f   :  { %v1731_v40 = vpop.f32.mrf.mxu1 }
 0x240   :  { %1989 = vst.msk [vmem:[%s4230_s5 + $0x18] sm:$0xff] %vm1986_vm3, %v1893_v37  ;;  %v1897_v43 = vadd.f32 %v1896_v28, %v1730_v39  ;;  %v1732_v46 = vadd.f32 %v1731_v40, %v4014_v35  ;;  %v1898_v22 = vpop.f32.mrf.mxu0 }
 0x241   :  { %v1735_v50 = vpop.f32.mrf.mxu1 }
 0x242   :  { %1990 = vst [vmem:[%s4230_s5 + $0x20] sm:$0xff] %v1897_v43  ;;  %v1899_v44 = vadd.f32 %v1898_v22, %v1732_v46  ;;  %v1736_v54 = vadd.f32 %v1735_v50, %v4016_v18  ;;  %v1902_v31 = vpop.f32.mrf.mxu0 }
 0x243   :  { %v1737_v55 = vpop.f32.mrf.mxu1 }
 0x244   :  { %1991 = vst.msk [vmem:[%s4230_s5 + $0x28] sm:$0xff] %vm1986_vm3, %v1899_v44  ;;  %v1903_v12 = vadd.f32 %v1902_v31, %v1736_v54  ;;  %v1738_v58 = vadd.f32 %v1737_v55, %v4018_v47  ;;  %v1904_v35 = vpop.f32.mrf.mxu0 }
 0x245   :  { %v1741_v57 = vpop.f32.mrf.mxu1 }
 0x246   :  { %1992 = vst [vmem:[%s4230_s5 + $0x30] sm:$0xff] %v1903_v12  ;;  %v1905_v5 = vadd.f32 %v1904_v35, %v1738_v58  ;;  %v1742_v63 = vadd.f32 %v1741_v57, %v4020_v42  ;;  %v1908_v18 = vpop.f32.mrf.mxu0 }
 0x247   :  { %v1743_v27 = vpop.f32.mrf.mxu1 }
 0x248   :  { %1993 = vst.msk [vmem:[%s4230_s5 + $0x38] sm:$0xff] %vm1986_vm3, %v1905_v5  ;;  %v1909_v4 = vadd.f32 %v1908_v18, %v1742_v63  ;;  %v1744_v26 = vadd.f32 %v1743_v27, %v4022_v45  ;;  %v1910_v47 = vpop.f32.mrf.mxu0 }
 0x249   :  { %v1747_v17 = vpop.f32.mrf.mxu1 }
 0x24a   :  { %1994 = vst [vmem:[%s4230_s5 + $0x40] sm:$0xff] %v1909_v4  ;;  %v1911_v9 = vadd.f32 %v1910_v47, %v1744_v26  ;;  %v1748_v10 = vadd.f32 %v1747_v17, %v4024_v51  ;;  %v1914_v42 = vpop.f32.mrf.mxu0 }
 0x24b   :  { %v1749_v13 = vpop.f32.mrf.mxu1 }
 0x24c   :  { %1995 = vst.msk [vmem:[%s4230_s5 + $0x48] sm:$0xff] %vm1986_vm3, %v1911_v9  ;;  %v1915_v14 = vadd.f32 %v1914_v42, %v1748_v10  ;;  %v1750_v20 = vadd.f32 %v1749_v13, %v4026_v53  ;;  %v1916_v45 = vpop.f32.mrf.mxu0 }
 0x24d   :  { %v1753_v25 = vpop.f32.mrf.mxu1 }
 0x24e   :  { %1996 = vst [vmem:[%s4230_s5 + $0x50] sm:$0xff] %v1915_v14  ;;  %v1917_v24 = vadd.f32 %v1916_v45, %v1750_v20  ;;  %v1754_v29 = vadd.f32 %v1753_v25, %v4028_v59  ;;  %v1920_v51 = vpop.f32.mrf.mxu0 }
 0x24f   :  { %v1755_v3 = vpop.f32.mrf.mxu1 }
 0x250   :  { %1997 = vst.msk [vmem:[%s4230_s5 + $0x58] sm:$0xff] %vm1986_vm3, %v1917_v24  ;;  %v1921_v33 = vadd.f32 %v1920_v51, %v1754_v29  ;;  %v1756_v19 = vadd.f32 %v1755_v3, %v4030_v7  ;;  %v1922_v53 = vpop.f32.mrf.mxu0 }
 0x251   :  { %v1759_v21 = vpop.f32.mrf.mxu1 }
 0x252   :  { %1998 = vst [vmem:[%s4230_s5 + $0x60] sm:$0xff] %v1921_v33  ;;  %v1923_v32 = vadd.f32 %v1922_v53, %v1756_v19  ;;  %v1760_v36 = vadd.f32 %v1759_v21, %v4032_v61  ;;  %v1926_v59 = vpop.f32.mrf.mxu0 }
 0x253   :  { %v1761_v37 = vpop.f32.mrf.mxu1 }
 0x254   :  { %1999 = vst.msk [vmem:[%s4230_s5 + $0x68] sm:$0xff] %vm1986_vm3, %v1923_v32  ;;  %v1927_v39 = vadd.f32 %v1926_v59, %v1760_v36  ;;  %v1762_v28 = vadd.f32 %v1761_v37, %v4034_v49  ;;  %v1928_v7 = vpop.f32.mrf.mxu0 }
 0x255   :  { %v1765_v40 = vpop.f32.mrf.mxu1 }
 0x256   :  { %2000 = vst [vmem:[%s4230_s5 + $0x70] sm:$0xff] %v1927_v39  ;;  %v1929_v43 = vadd.f32 %v1928_v7, %v1762_v28  ;;  %v1766_v46 = vadd.f32 %v1765_v40, %v4036_v0  ;;  %v1932_v61 = vpop.f32.mrf.mxu0 }
 0x257   :  { %v1767_v22 = vpop.f32.mrf.mxu1 }
 0x258   :  { %2001 = vst.msk [vmem:[%s4230_s5 + $0x78] sm:$0xff] %vm1986_vm3, %v1929_v43  ;;  %v1933_v50 = vadd.f32 %v1932_v61, %v1766_v46  ;;  %v1768_v44 = vadd.f32 %v1767_v22, %v4038_v2  ;;  %v1934_v49 = vpop.f32.mrf.mxu0 }
 0x259   :  { %v1771_v54 = vpop.f32.mrf.mxu1 }
 0x25a   :  { %2002 = vst [vmem:[%s4230_s5 + $0x80] sm:$0xff] %v1933_v50  ;;  %v1935_v31 = vadd.f32 %v1934_v49, %v1768_v44  ;;  %v1772_v55 = vadd.f32 %v1771_v54, %v4040_v15  ;;  %v1938_v0 = vpop.f32.mrf.mxu0 }
 0x25b   :  { %v1773_v12 = vpop.f32.mrf.mxu1 }
 0x25c   :  { %2003 = vst.msk [vmem:[%s4230_s5 + $0x88] sm:$0xff] %vm1986_vm3, %v1935_v31  ;;  %v1939_v58 = vadd.f32 %v1938_v0, %v1772_v55  ;;  %v1774_v35 = vadd.f32 %v1773_v12, %v4042_v8  ;;  %v1940_v2 = vpop.f32.mrf.mxu0 }
 0x25d   :  { %v1777_v57 = vpop.f32.mrf.mxu1 }
 0x25e   :  { %2004 = vst [vmem:[%s4230_s5 + $0x90] sm:$0xff] %v1939_v58  ;;  %v1941_v5 = vadd.f32 %v1940_v2, %v1774_v35  ;;  %v1778_v63 = vadd.f32 %v1777_v57, %v4044_v11  ;;  %v1944_v15 = vpop.f32.mrf.mxu0 }
 0x25f   :  { %v1779_v18 = vpop.f32.mrf.mxu1 }
 0x260   :  { %2005 = vst.msk [vmem:[%s4230_s5 + $0x98] sm:$0xff] %vm1986_vm3, %v1941_v5  ;;  %v1945_v27 = vadd.f32 %v1944_v15, %v1778_v63  ;;  %v1780_v4 = vadd.f32 %v1779_v18, %v4046_v16  ;;  %v1946_v8 = vpop.f32.mrf.mxu0 }
 0x261   :  { %v1783_v26 = vpop.f32.mrf.mxu1 }
 0x262   :  { %2006 = vst [vmem:[%s4230_s5 + $0xa0] sm:$0xff] %v1945_v27  ;;  %v1947_v47 = vadd.f32 %v1946_v8, %v1780_v4  ;;  %v1784_v17 = vadd.f32 %v1783_v26, %v4048_v23  ;;  %v1950_v11 = vpop.f32.mrf.mxu0 }
 0x263   :  { %v1785_v9 = vpop.f32.mrf.mxu1 }
 0x264   :  { %2007 = vst.msk [vmem:[%s4230_s5 + $0xa8] sm:$0xff] %vm1986_vm3, %v1947_v47  ;;  %v1951_v10 = vadd.f32 %v1950_v11, %v1784_v17  ;;  %v1786_v42 = vadd.f32 %v1785_v9, %v4050_v30  ;;  %v1952_v16 = vpop.f32.mrf.mxu0 }
 0x265   :  { %v1789_v13 = vpop.f32.mrf.mxu1 }
 0x266   :  { %2008 = vst [vmem:[%s4230_s5 + $0xb0] sm:$0xff] %v1951_v10  ;;  %v1953_v14 = vadd.f32 %v1952_v16, %v1786_v42  ;;  %v1790_v33 = vadd.f32 %v1789_v13, %v4052_v34 }
 0x267   :  { %v1791_v20 = vpop.f32.mrf.mxu1 }
 0x268   :  { %2009 = vst.msk [vmem:[%s4230_s5 + $0xb8] sm:$0xff] %vm1986_vm3, %v1953_v14  ;;  %v1792_v53 = vadd.f32 %v1791_v20, %v4054_v38 }
 0x269   :  { %v1795_v23 = vpop.f32.mrf.mxu1 }
 0x26a   :  { %v1796_v36 = vadd.f32 %v1795_v23, %v4056_v41 }
 0x26b   :  { %v1797_v45 = vpop.f32.mrf.mxu1 }
 0x26c   :  { %v1798_v39 = vadd.f32 %v1797_v45, %v4058_v48 }
 0x26d   :  { %v1801_v25 = vpop.f32.mrf.mxu1 }
 0x26e   :  { %v1802_v38 = vadd.f32 %v1801_v25, %v4060_v52 }
 0x26f   :  { %v1803_v24 = vpop.f32.mrf.mxu1 }
 0x270   :  { %v1804_v40 = vadd.f32 %v1803_v24, %v4062_v56 }
 0x271   :  { %v1807_v29 = vpop.f32.mrf.mxu1 }
 0x272   :  { %v1808_v46 = vadd.f32 %v1807_v29, %v4064_v60 }
 0x273   :  { %v1809_v51 = vpop.f32.mrf.mxu1 }
 0x274   :  { %v1810_v22 = vadd.f32 %v1809_v51, %v4066_v62 }
 0x275   :  { %v1813_v30 = vpop.f32.mrf.mxu1 }
 0x276   :  { %v1814_v44 = vadd.f32 %v1813_v30, %v4068_v1 }
 0x277   :  { %v1815_v3 = vpop.f32.mrf.mxu1 }
 0x278   :  { %v1816_v54 = vadd.f32 %v1815_v3, %v4070_v6 }
 0x279   :  { %v1956_v19 = vpop.f32.mrf.mxu1 }
 0x27a   :  { %v1957_v21 = vadd.f32 %v1956_v19, %v1790_v33 }
 0x27b   :  { %v1958_v32 = vpop.f32.mrf.mxu1 }
 0x27c   :  { %2010 = vst [vmem:[%s4230_s5 + $0xc0] sm:$0xff] %v1957_v21  ;;  %v1959_v59 = vadd.f32 %v1958_v32, %v1792_v53 }
 0x27d   :  { %v1962_v37 = vpop.f32.mrf.mxu1 }
 0x27e   :  { %2011 = vst.msk [vmem:[%s4230_s5 + $0xc8] sm:$0xff] %vm1986_vm3, %v1959_v59  ;;  %v1963_v34 = vadd.f32 %v1962_v37, %v1796_v36 }
 0x27f   :  { %v1964_v28 = vpop.f32.mrf.mxu1 }
 0x280   :  { %2012 = vst [vmem:[%s4230_s5 + $0xd0] sm:$0xff] %v1963_v34  ;;  %v1965_v41 = vadd.f32 %v1964_v28, %v1798_v39 }
 0x281   :  { %v1968_v7 = vpop.f32.mrf.mxu1 }
 0x282   :  { %2013 = vst.msk [vmem:[%s4230_s5 + $0xd8] sm:$0xff] %vm1986_vm3, %v1965_v41  ;;  %v1969_v48 = vadd.f32 %v1968_v7, %v1802_v38 }
 0x283   :  { %v1970_v43 = vpop.f32.mrf.mxu1 }
 0x284   :  { %2014 = vst [vmem:[%s4230_s5 + $0xe0] sm:$0xff] %v1969_v48  ;;  %v1971_v52 = vadd.f32 %v1970_v43, %v1804_v40 }
 0x285   :  { %v1974_v61 = vpop.f32.mrf.mxu1 }
 0x286   :  { %2015 = vst.msk [vmem:[%s4230_s5 + $0xe8] sm:$0xff] %vm1986_vm3, %v1971_v52  ;;  %v1975_v56 = vadd.f32 %v1974_v61, %v1808_v46 }
 0x287   :  { %v1976_v50 = vpop.f32.mrf.mxu1 }
 0x288   :  { %2016 = vst [vmem:[%s4230_s5 + $0xf0] sm:$0xff] %v1975_v56  ;;  %v1977_v60 = vadd.f32 %v1976_v50, %v1810_v22 }
 0x289   :  { %v1980_v49 = vpop.f32.mrf.mxu1 }
 0x28a   :  { %2017 = vst.msk [vmem:[%s4230_s5 + $0xf8] sm:$0xff] %vm1986_vm3, %v1977_v60  ;;  %v1981_v62 = vadd.f32 %v1980_v49, %v1814_v44 }
 0x28b   :  { %v1982_v31 = vpop.f32.mrf.mxu1 }
 0x28c   :  { %2018 = vst [vmem:[%s4230_s5 + $0x100] sm:$0xff] %v1981_v62  ;;  %v1983_v1 = vadd.f32 %v1982_v31, %v1816_v54 }
 0x28e   :  { %2019 = vst.msk [vmem:[%s4230_s5 + $0x108] sm:$0xff] %vm1986_vm3, %v1983_v1 }

</bundles_post_ra>
